<compile_context>
chip_gen: v7x
topology: tpu7x:2x2x1
jax: 0.10.0
libtpu: 0.0.40
codegen_flags: <defaults>
</compile_context>

<pallas_src>
import jax
import jax.numpy as jnp
from jax import lax
from jax.experimental import pallas as pl
from jax.experimental.pallas import tpu as pltpu


# ----------------------------- helpers ---------------------------------------

def _const_spec(shape):
    nd = len(shape)
    return pl.BlockSpec(shape, lambda n, _nd=nd: (0,) * _nd)


def _selection_matrix(h, w, stride):
    """(Ho*Wo, H*W) one-hot rows picking the strided output positions."""
    ho = (h - 1) // stride + 1
    wo = (w - 1) // stride + 1
    rows = jnp.arange(ho) * stride
    cols = jnp.arange(wo) * stride
    src = (rows[:, None] * w + cols[None, :]).reshape(-1)        # (Ho*Wo,)
    return jax.nn.one_hot(src, h * w, dtype=jnp.float32)         # (Ho*Wo, H*W)


# ----------------------------- fused kernel ----------------------------------

def _make_bottleneck_kernel(h, w, cin, planes, cout, stride, has_shortcut):
    hw = h * w

    def kernel(*refs):
        it = iter(refs)
        x_ref = next(it)
        w1_ref, s1_ref, b1_ref = next(it), next(it), next(it)
        w2_ref, s2_ref, b2_ref = next(it), next(it), next(it)
        w3_ref, s3_ref, b3_ref = next(it), next(it), next(it)
        if has_shortcut:
            wsc_ref, ssc_ref, bsc_ref = next(it), next(it), next(it)
        if stride > 1:
            sel_ref = next(it)
        out_ref = next(it)
        pad_ref = next(it)

        x2 = x_ref[0]                                            # (H*W, Cin) bf16

        # ---- conv1 (1x1) + bn1 + relu -----------------------------------
        o1 = jnp.dot(x2, w1_ref[...], preferred_element_type=jnp.float32)
        o1 = jnp.maximum(o1 * s1_ref[...] + b1_ref[...], 0.0)    # (H*W, planes) f32

        # ---- conv2 (3x3, pad=1), evaluated densely (stride applied later) --
        pad_ref[...] = jnp.zeros_like(pad_ref)
        pad_ref[1:h + 1, 1:w + 1, :] = o1.reshape(h, w, planes)
        acc = jnp.zeros((hw, planes), jnp.float32)
        for kh in range(3):
            for kw in range(3):
                tap = pad_ref[kh:kh + h, kw:kw + w, :].reshape(hw, planes)
                acc = acc + jnp.dot(tap.astype(jnp.bfloat16),
                                    w2_ref[kh * 3 + kw],
                                    preferred_element_type=jnp.float32)
        o2 = jnp.maximum(acc * s2_ref[...] + b2_ref[...], 0.0)   # (H*W, planes) f32

        # ---- conv3 (1x1) + bn3 -------------------------------------------
        o3 = jnp.dot(o2.astype(jnp.bfloat16), w3_ref[...],
                     preferred_element_type=jnp.float32)
        o3 = o3 * s3_ref[...] + b3_ref[...]                      # (H*W, cout) f32

        # ---- shortcut (1x1 conv + bn, or identity) -------------------------
        if has_shortcut:
            sc = jnp.dot(x2, wsc_ref[...], preferred_element_type=jnp.float32)
            sc = sc * ssc_ref[...] + bsc_ref[...]
        else:
            sc = x2.astype(jnp.float32)

        y = jnp.maximum(o3 + sc, 0.0)                            # (H*W, cout) f32

        # ---- apply the conv2/shortcut stride: pick rows (s*ho, s*wo) ------
        # (1x1 convs, BN, ReLU and the add are pointwise in space, so spatial
        # subsampling commutes to the very end; one exact one-hot matmul.)
        if stride > 1:
            y = jnp.dot(sel_ref[...], y, preferred_element_type=jnp.float32)

        out_ref[0] = y                                           # (Ho*Wo, cout)

    return kernel


def bottleneck_forward(x_nchw, params):
    stride = int(params["stride"])
    w1, w2, w3 = params["w1"], params["w2"], params["w3"]
    n, cin, h, w = x_nchw.shape
    planes = w1.shape[1]
    cout = w3.shape[1]
    ho = (h - 1) // stride + 1
    wo = (w - 1) // stride + 1
    has_shortcut = "wsc" in params

    # NCHW -> NHWC -> (N, H*W, Cin), bf16 for the MXU
    x2d = jnp.transpose(x_nchw, (0, 2, 3, 1)).reshape(n, h * w, cin)
    x2d = x2d.astype(jnp.bfloat16)

    inputs = [
        x2d,
        w1.astype(jnp.bfloat16), params["bn1_scale"], params["bn1_shift"],
        w2.reshape(9, planes, planes).astype(jnp.bfloat16),
        params["bn2_scale"], params["bn2_shift"],
        w3.astype(jnp.bfloat16), params["bn3_scale"], params["bn3_shift"],
    ]
    if has_shortcut:
        inputs += [params["wsc"].astype(jnp.bfloat16),
                   params["bnsc_scale"], params["bnsc_shift"]]
    if stride > 1:
        inputs.append(_selection_matrix(h, w, stride))

    in_specs = [pl.BlockSpec((1, h * w, cin), lambda i: (i, 0, 0))]
    in_specs += [_const_spec(a.shape) for a in inputs[1:]]

    kernel = _make_bottleneck_kernel(h, w, cin, planes, cout, stride, has_shortcut)

    out = pl.pallas_call(
        kernel,
        out_shape=jax.ShapeDtypeStruct((n, ho * wo, cout), jnp.float32),
        grid=(n,),
        in_specs=in_specs,
        out_specs=pl.BlockSpec((1, ho * wo, cout), lambda i: (i, 0, 0)),
        scratch_shapes=[pltpu.VMEM((h + 2, w + 2, planes), jnp.float32)],
        compiler_params=pltpu.CompilerParams(
            dimension_semantics=("parallel",)),
    )(*inputs)

    return jnp.transpose(out.reshape(n, ho, wo, cout), (0, 3, 1, 2))   # NCHW


# ----------------------------- reference (pure JAX) ---------------------------

def bottleneck_reference(x_nchw, params):
    stride = int(params["stride"])
    cin = params["w1"].shape[0]
    planes = params["w1"].shape[1]
    cout = params["w3"].shape[1]
    dn = ("NHWC", "HWIO", "NHWC")
    x = jnp.transpose(x_nchw, (0, 2, 3, 1)).astype(jnp.bfloat16)

    def conv(v, w_hwio, s, pad):
        return lax.conv_general_dilated(
            v, w_hwio.astype(jnp.bfloat16), window_strides=(s, s),
            padding=((pad, pad), (pad, pad)), dimension_numbers=dn,
            preferred_element_type=jnp.float32)

    def bn(v, scale, shift):
        return v * scale.reshape(1, 1, 1, -1) + shift.reshape(1, 1, 1, -1)

    o = conv(x, params["w1"].reshape(1, 1, cin, planes), 1, 0)
    o = jnp.maximum(bn(o, params["bn1_scale"], params["bn1_shift"]), 0.0)
    o = conv(o.astype(jnp.bfloat16), params["w2"], stride, 1)
    o = jnp.maximum(bn(o, params["bn2_scale"], params["bn2_shift"]), 0.0)
    o = bn(conv(o.astype(jnp.bfloat16), params["w3"].reshape(1, 1, planes, cout), 1, 0),
           params["bn3_scale"], params["bn3_shift"])
    if "wsc" in params:
        sc = bn(conv(x, params["wsc"].reshape(1, 1, cin, cout), stride, 0),
                params["bnsc_scale"], params["bnsc_shift"])
    else:
        sc = x.astype(jnp.float32)
    y = jnp.maximum(o + sc, 0.0)
    return jnp.transpose(y, (0, 3, 1, 2))


# ----------------------------- deterministic params ---------------------------

def init_params(key, in_planes, planes, stride, expansion=4):
    cout = expansion * planes
    keys = jax.random.split(key, 12)
    eps = 1e-5

    def he(k, shape, fan_in):
        return jax.random.normal(k, shape, jnp.float32) * jnp.sqrt(2.0 / fan_in)

    def bn(kg, kb, c):
        gamma = 1.0 + 0.1 * jax.random.normal(kg, (c,), jnp.float32)
        beta = 0.1 * jax.random.normal(kb, (c,), jnp.float32)
        mean = jnp.zeros((c,), jnp.float32)
        var = jnp.ones((c,), jnp.float32)
        scale = gamma / jnp.sqrt(var + eps)
        shift = beta - mean * scale
        return scale.reshape(1, c), shift.reshape(1, c)

    p = {"stride": stride}
    p["w1"] = he(keys[0], (in_planes, planes), in_planes)            # 1x1 conv as matrix
    p["w2"] = he(keys[1], (3, 3, planes, planes), 9 * planes)        # HWIO
    p["w3"] = he(keys[2], (planes, cout), planes)
    p["bn1_scale"], p["bn1_shift"] = bn(keys[3], keys[4], planes)
    p["bn2_scale"], p["bn2_shift"] = bn(keys[5], keys[6], planes)
    p["bn3_scale"], p["bn3_shift"] = bn(keys[7], keys[8], cout)
    if stride != 1 or in_planes != cout:
        p["wsc"] = he(keys[9], (in_planes, cout), in_planes)
        p["bnsc_scale"], p["bnsc_shift"] = bn(keys[10], keys[11], cout)
    return p


if __name__ == "__main__":
    root = jax.random.PRNGKey(0)
    pkey, xkey = jax.random.split(root)

    in_planes, planes, stride = 64, 32, 2        # exercises strided 3x3 + conv shortcut
    params = init_params(pkey, in_planes, planes, stride)
    x = jax.random.normal(xkey, (2, in_planes, 16, 16), jnp.float32)   # NCHW like PyTorch

    out = bottleneck_forward(x, params)
    jax.block_until_ready(out)

    assert out.shape == (2, 4 * planes, 8, 8), out.shape
    assert bool(jnp.all(jnp.isfinite(out)))

    ref = bottleneck_reference(x, params)
    err = float(jnp.max(jnp.abs(out - ref)))
    assert err < 5e-2, f"max abs err vs reference = {err}"

    print("KERNEL_OK")
</pallas_src>

<mosaic_0001>
module attributes {stable_mosaic.version = 11 : i64} {
  func.func @kernel(%arg0: i32, %arg1: memref<1x256x64xbf16, #tpu.memory_space<vmem>>, %arg2: memref<64x32xbf16, #tpu.memory_space<vmem>>, %arg3: memref<1x32xf32, #tpu.memory_space<vmem>>, %arg4: memref<1x32xf32, #tpu.memory_space<vmem>>, %arg5: memref<9x32x32xbf16, #tpu.memory_space<vmem>>, %arg6: memref<1x32xf32, #tpu.memory_space<vmem>>, %arg7: memref<1x32xf32, #tpu.memory_space<vmem>>, %arg8: memref<32x128xbf16, #tpu.memory_space<vmem>>, %arg9: memref<1x128xf32, #tpu.memory_space<vmem>>, %arg10: memref<1x128xf32, #tpu.memory_space<vmem>>, %arg11: memref<64x128xbf16, #tpu.memory_space<vmem>>, %arg12: memref<1x128xf32, #tpu.memory_space<vmem>>, %arg13: memref<1x128xf32, #tpu.memory_space<vmem>>, %arg14: memref<64x256xf32, #tpu.memory_space<vmem>>, %arg15: memref<1x64x128xf32, #tpu.memory_space<vmem>>, %arg16: memref<18x18x32xf32, #tpu.memory_space<vmem>>) attributes {dimension_semantics = [#tpu.dimension_semantics<parallel>], iteration_bounds = array<i64: 2>, scalar_prefetch = 0 : i64, scratch_operands = 1 : i64, tpu.core_type = #tpu.core_type<tc>, window_params = [{transform_indices = @transform_0, window_bounds = array<i64: 1, 256, 64>}, {pipeline_mode = #tpu.pipeline_mode<synchronous>, transform_indices = @transform_1, window_bounds = array<i64: 64, 32>}, {pipeline_mode = #tpu.pipeline_mode<synchronous>, transform_indices = @transform_2, window_bounds = array<i64: 1, 32>}, {pipeline_mode = #tpu.pipeline_mode<synchronous>, transform_indices = @transform_3, window_bounds = array<i64: 1, 32>}, {pipeline_mode = #tpu.pipeline_mode<synchronous>, transform_indices = @transform_4, window_bounds = array<i64: 9, 32, 32>}, {pipeline_mode = #tpu.pipeline_mode<synchronous>, transform_indices = @transform_5, window_bounds = array<i64: 1, 32>}, {pipeline_mode = #tpu.pipeline_mode<synchronous>, transform_indices = @transform_6, window_bounds = array<i64: 1, 32>}, {pipeline_mode = #tpu.pipeline_mode<synchronous>, transform_indices = @transform_7, window_bounds = array<i64: 32, 128>}, {pipeline_mode = #tpu.pipeline_mode<synchronous>, transform_indices = @transform_8, window_bounds = array<i64: 1, 128>}, {pipeline_mode = #tpu.pipeline_mode<synchronous>, transform_indices = @transform_9, window_bounds = array<i64: 1, 128>}, {pipeline_mode = #tpu.pipeline_mode<synchronous>, transform_indices = @transform_10, window_bounds = array<i64: 64, 128>}, {pipeline_mode = #tpu.pipeline_mode<synchronous>, transform_indices = @transform_11, window_bounds = array<i64: 1, 128>}, {pipeline_mode = #tpu.pipeline_mode<synchronous>, transform_indices = @transform_12, window_bounds = array<i64: 1, 128>}, {pipeline_mode = #tpu.pipeline_mode<synchronous>, transform_indices = @transform_13, window_bounds = array<i64: 64, 256>}, {transform_indices = @transform_14, window_bounds = array<i64: 1, 64, 128>}]} {
    %c0 = arith.constant 0 : index
    %c0_0 = arith.constant 0 : index
    %c0_1 = arith.constant 0 : index
    %0 = vector.load %arg1[%c0, %c0_0, %c0_1] : memref<1x256x64xbf16, #tpu.memory_space<vmem>>, vector<1x256x64xbf16>
    %1 = vector.shape_cast %0 : vector<1x256x64xbf16> to vector<256x64xbf16>
    %c0_2 = arith.constant 0 : index
    %c0_3 = arith.constant 0 : index
    %2 = vector.load %arg2[%c0_2, %c0_3] : memref<64x32xbf16, #tpu.memory_space<vmem>>, vector<64x32xbf16>
    %cst = arith.constant dense<0.000000e+00> : vector<256x32xf32>
    %3 = tpu.matmul %1, %2, %cst {dimension_numbers = #tpu.dot_dimension_numbers<[1], [0], [0], [1], [0, 0, 1, 1], [], []>} : vector<256x64xbf16>, vector<64x32xbf16>, vector<256x32xf32> -> vector<256x32xf32>
    %c0_4 = arith.constant 0 : index
    %c0_5 = arith.constant 0 : index
    %4 = vector.load %arg3[%c0_4, %c0_5] : memref<1x32xf32, #tpu.memory_space<vmem>>, vector<1x32xf32>
    %5 = vector.broadcast %4 : vector<1x32xf32> to vector<256x32xf32>
    %6 = arith.mulf %3, %5 : vector<256x32xf32>
    %c0_6 = arith.constant 0 : index
    %c0_7 = arith.constant 0 : index
    %7 = vector.load %arg4[%c0_6, %c0_7] : memref<1x32xf32, #tpu.memory_space<vmem>>, vector<1x32xf32>
    %8 = vector.broadcast %7 : vector<1x32xf32> to vector<256x32xf32>
    %9 = arith.addf %6, %8 : vector<256x32xf32>
    %cst_8 = arith.constant 0.000000e+00 : f32
    %10 = vector.broadcast %cst_8 : f32 to vector<256x32xf32>
    %11 = arith.maximumf %9, %10 : vector<256x32xf32>
    %cst_9 = arith.constant 0.000000e+00 : f32
    %12 = vector.broadcast %cst_9 : f32 to vector<18x18x32xf32>
    %c0_10 = arith.constant 0 : index
    %c0_11 = arith.constant 0 : index
    %c0_12 = arith.constant 0 : index
    %13 = vector.load %arg16[%c0_10, %c0_11, %c0_12] : memref<18x18x32xf32, #tpu.memory_space<vmem>>, vector<18x18x32xf32>
    tpu.vector_store %arg16[%c0_10, %c0_11, %c0_12], %12 {strides = array<i32>} : memref<18x18x32xf32, #tpu.memory_space<vmem>>, vector<18x18x32xf32>,
    %14 = vector.shape_cast %11 : vector<256x32xf32> to vector<16x16x32xf32>
    %c1 = arith.constant 1 : index
    %c1_13 = arith.constant 1 : index
    %c0_14 = arith.constant 0 : index
    %15 = vector.load %arg16[%c1, %c1_13, %c0_14] : memref<18x18x32xf32, #tpu.memory_space<vmem>>, vector<16x16x32xf32>
    tpu.vector_store %arg16[%c1, %c1_13, %c0_14], %14 {strides = array<i32>} : memref<18x18x32xf32, #tpu.memory_space<vmem>>, vector<16x16x32xf32>,
    %cst_15 = arith.constant 0.000000e+00 : f32
    %16 = vector.broadcast %cst_15 : f32 to vector<256x32xf32>
    %c0_16 = arith.constant 0 : index
    %c0_17 = arith.constant 0 : index
    %c0_18 = arith.constant 0 : index
    %17 = vector.load %arg16[%c0_16, %c0_17, %c0_18] : memref<18x18x32xf32, #tpu.memory_space<vmem>>, vector<16x16x32xf32>
    %18 = vector.shape_cast %17 : vector<16x16x32xf32> to vector<256x32xf32>
    %19 = arith.truncf %18 : vector<256x32xf32> to vector<256x32xbf16>
    %c0_19 = arith.constant 0 : index
    %c0_20 = arith.constant 0 : index
    %c0_21 = arith.constant 0 : index
    %20 = vector.load %arg5[%c0_19, %c0_20, %c0_21] : memref<9x32x32xbf16, #tpu.memory_space<vmem>>, vector<1x32x32xbf16>
    %21 = vector.shape_cast %20 : vector<1x32x32xbf16> to vector<32x32xbf16>
    %cst_22 = arith.constant dense<0.000000e+00> : vector<256x32xf32>
    %22 = tpu.matmul %19, %21, %cst_22 {dimension_numbers = #tpu.dot_dimension_numbers<[1], [0], [0], [1], [0, 0, 1, 1], [], []>} : vector<256x32xbf16>, vector<32x32xbf16>, vector<256x32xf32> -> vector<256x32xf32>
    %23 = arith.addf %16, %22 : vector<256x32xf32>
    %c0_23 = arith.constant 0 : index
    %c1_24 = arith.constant 1 : index
    %c0_25 = arith.constant 0 : index
    %24 = vector.load %arg16[%c0_23, %c1_24, %c0_25] : memref<18x18x32xf32, #tpu.memory_space<vmem>>, vector<16x16x32xf32>
    %25 = vector.shape_cast %24 : vector<16x16x32xf32> to vector<256x32xf32>
    %26 = arith.truncf %25 : vector<256x32xf32> to vector<256x32xbf16>
    %c1_26 = arith.constant 1 : index
    %c0_27 = arith.constant 0 : index
    %c0_28 = arith.constant 0 : index
    %27 = vector.load %arg5[%c1_26, %c0_27, %c0_28] : memref<9x32x32xbf16, #tpu.memory_space<vmem>>, vector<1x32x32xbf16>
    %28 = vector.shape_cast %27 : vector<1x32x32xbf16> to vector<32x32xbf16>
    %cst_29 = arith.constant dense<0.000000e+00> : vector<256x32xf32>
    %29 = tpu.matmul %26, %28, %cst_29 {dimension_numbers = #tpu.dot_dimension_numbers<[1], [0], [0], [1], [0, 0, 1, 1], [], []>} : vector<256x32xbf16>, vector<32x32xbf16>, vector<256x32xf32> -> vector<256x32xf32>
    %30 = arith.addf %23, %29 : vector<256x32xf32>
    %c0_30 = arith.constant 0 : index
    %c2 = arith.constant 2 : index
    %c0_31 = arith.constant 0 : index
    %31 = vector.load %arg16[%c0_30, %c2, %c0_31] : memref<18x18x32xf32, #tpu.memory_space<vmem>>, vector<16x16x32xf32>
    %32 = vector.shape_cast %31 : vector<16x16x32xf32> to vector<256x32xf32>
    %33 = arith.truncf %32 : vector<256x32xf32> to vector<256x32xbf16>
    %c2_32 = arith.constant 2 : index
    %c0_33 = arith.constant 0 : index
    %c0_34 = arith.constant 0 : index
    %34 = vector.load %arg5[%c2_32, %c0_33, %c0_34] : memref<9x32x32xbf16, #tpu.memory_space<vmem>>, vector<1x32x32xbf16>
    %35 = vector.shape_cast %34 : vector<1x32x32xbf16> to vector<32x32xbf16>
    %cst_35 = arith.constant dense<0.000000e+00> : vector<256x32xf32>
    %36 = tpu.matmul %33, %35, %cst_35 {dimension_numbers = #tpu.dot_dimension_numbers<[1], [0], [0], [1], [0, 0, 1, 1], [], []>} : vector<256x32xbf16>, vector<32x32xbf16>, vector<256x32xf32> -> vector<256x32xf32>
    %37 = arith.addf %30, %36 : vector<256x32xf32>
    %c1_36 = arith.constant 1 : index
    %c0_37 = arith.constant 0 : index
    %c0_38 = arith.constant 0 : index
    %38 = vector.load %arg16[%c1_36, %c0_37, %c0_38] : memref<18x18x32xf32, #tpu.memory_space<vmem>>, vector<16x16x32xf32>
    %39 = vector.shape_cast %38 : vector<16x16x32xf32> to vector<256x32xf32>
    %40 = arith.truncf %39 : vector<256x32xf32> to vector<256x32xbf16>
    %c3 = arith.constant 3 : index
    %c0_39 = arith.constant 0 : index
    %c0_40 = arith.constant 0 : index
    %41 = vector.load %arg5[%c3, %c0_39, %c0_40] : memref<9x32x32xbf16, #tpu.memory_space<vmem>>, vector<1x32x32xbf16>
    %42 = vector.shape_cast %41 : vector<1x32x32xbf16> to vector<32x32xbf16>
    %cst_41 = arith.constant dense<0.000000e+00> : vector<256x32xf32>
    %43 = tpu.matmul %40, %42, %cst_41 {dimension_numbers = #tpu.dot_dimension_numbers<[1], [0], [0], [1], [0, 0, 1, 1], [], []>} : vector<256x32xbf16>, vector<32x32xbf16>, vector<256x32xf32> -> vector<256x32xf32>
    %44 = arith.addf %37, %43 : vector<256x32xf32>
    %c1_42 = arith.constant 1 : index
    %c1_43 = arith.constant 1 : index
    %c0_44 = arith.constant 0 : index
    %45 = vector.load %arg16[%c1_42, %c1_43, %c0_44] : memref<18x18x32xf32, #tpu.memory_space<vmem>>, vector<16x16x32xf32>
    %46 = vector.shape_cast %45 : vector<16x16x32xf32> to vector<256x32xf32>
    %47 = arith.truncf %46 : vector<256x32xf32> to vector<256x32xbf16>
    %c4 = arith.constant 4 : index
    %c0_45 = arith.constant 0 : index
    %c0_46 = arith.constant 0 : index
    %48 = vector.load %arg5[%c4, %c0_45, %c0_46] : memref<9x32x32xbf16, #tpu.memory_space<vmem>>, vector<1x32x32xbf16>
    %49 = vector.shape_cast %48 : vector<1x32x32xbf16> to vector<32x32xbf16>
    %cst_47 = arith.constant dense<0.000000e+00> : vector<256x32xf32>
    %50 = tpu.matmul %47, %49, %cst_47 {dimension_numbers = #tpu.dot_dimension_numbers<[1], [0], [0], [1], [0, 0, 1, 1], [], []>} : vector<256x32xbf16>, vector<32x32xbf16>, vector<256x32xf32> -> vector<256x32xf32>
    %51 = arith.addf %44, %50 : vector<256x32xf32>
    %c1_48 = arith.constant 1 : index
    %c2_49 = arith.constant 2 : index
    %c0_50 = arith.constant 0 : index
    %52 = vector.load %arg16[%c1_48, %c2_49, %c0_50] : memref<18x18x32xf32, #tpu.memory_space<vmem>>, vector<16x16x32xf32>
    %53 = vector.shape_cast %52 : vector<16x16x32xf32> to vector<256x32xf32>
    %54 = arith.truncf %53 : vector<256x32xf32> to vector<256x32xbf16>
    %c5 = arith.constant 5 : index
    %c0_51 = arith.constant 0 : index
    %c0_52 = arith.constant 0 : index
    %55 = vector.load %arg5[%c5, %c0_51, %c0_52] : memref<9x32x32xbf16, #tpu.memory_space<vmem>>, vector<1x32x32xbf16>
    %56 = vector.shape_cast %55 : vector<1x32x32xbf16> to vector<32x32xbf16>
    %cst_53 = arith.constant dense<0.000000e+00> : vector<256x32xf32>
    %57 = tpu.matmul %54, %56, %cst_53 {dimension_numbers = #tpu.dot_dimension_numbers<[1], [0], [0], [1], [0, 0, 1, 1], [], []>} : vector<256x32xbf16>, vector<32x32xbf16>, vector<256x32xf32> -> vector<256x32xf32>
    %58 = arith.addf %51, %57 : vector<256x32xf32>
    %c2_54 = arith.constant 2 : index
    %c0_55 = arith.constant 0 : index
    %c0_56 = arith.constant 0 : index
    %59 = vector.load %arg16[%c2_54, %c0_55, %c0_56] : memref<18x18x32xf32, #tpu.memory_space<vmem>>, vector<16x16x32xf32>
    %60 = vector.shape_cast %59 : vector<16x16x32xf32> to vector<256x32xf32>
    %61 = arith.truncf %60 : vector<256x32xf32> to vector<256x32xbf16>
    %c6 = arith.constant 6 : index
    %c0_57 = arith.constant 0 : index
    %c0_58 = arith.constant 0 : index
    %62 = vector.load %arg5[%c6, %c0_57, %c0_58] : memref<9x32x32xbf16, #tpu.memory_space<vmem>>, vector<1x32x32xbf16>
    %63 = vector.shape_cast %62 : vector<1x32x32xbf16> to vector<32x32xbf16>
    %cst_59 = arith.constant dense<0.000000e+00> : vector<256x32xf32>
    %64 = tpu.matmul %61, %63, %cst_59 {dimension_numbers = #tpu.dot_dimension_numbers<[1], [0], [0], [1], [0, 0, 1, 1], [], []>} : vector<256x32xbf16>, vector<32x32xbf16>, vector<256x32xf32> -> vector<256x32xf32>
    %65 = arith.addf %58, %64 : vector<256x32xf32>
    %c2_60 = arith.constant 2 : index
    %c1_61 = arith.constant 1 : index
    %c0_62 = arith.constant 0 : index
    %66 = vector.load %arg16[%c2_60, %c1_61, %c0_62] : memref<18x18x32xf32, #tpu.memory_space<vmem>>, vector<16x16x32xf32>
    %67 = vector.shape_cast %66 : vector<16x16x32xf32> to vector<256x32xf32>
    %68 = arith.truncf %67 : vector<256x32xf32> to vector<256x32xbf16>
    %c7 = arith.constant 7 : index
    %c0_63 = arith.constant 0 : index
    %c0_64 = arith.constant 0 : index
    %69 = vector.load %arg5[%c7, %c0_63, %c0_64] : memref<9x32x32xbf16, #tpu.memory_space<vmem>>, vector<1x32x32xbf16>
    %70 = vector.shape_cast %69 : vector<1x32x32xbf16> to vector<32x32xbf16>
    %cst_65 = arith.constant dense<0.000000e+00> : vector<256x32xf32>
    %71 = tpu.matmul %68, %70, %cst_65 {dimension_numbers = #tpu.dot_dimension_numbers<[1], [0], [0], [1], [0, 0, 1, 1], [], []>} : vector<256x32xbf16>, vector<32x32xbf16>, vector<256x32xf32> -> vector<256x32xf32>
    %72 = arith.addf %65, %71 : vector<256x32xf32>
    %c2_66 = arith.constant 2 : index
    %c2_67 = arith.constant 2 : index
    %c0_68 = arith.constant 0 : index
    %73 = vector.load %arg16[%c2_66, %c2_67, %c0_68] : memref<18x18x32xf32, #tpu.memory_space<vmem>>, vector<16x16x32xf32>
    %74 = vector.shape_cast %73 : vector<16x16x32xf32> to vector<256x32xf32>
    %75 = arith.truncf %74 : vector<256x32xf32> to vector<256x32xbf16>
    %c8 = arith.constant 8 : index
    %c0_69 = arith.constant 0 : index
    %c0_70 = arith.constant 0 : index
    %76 = vector.load %arg5[%c8, %c0_69, %c0_70] : memref<9x32x32xbf16, #tpu.memory_space<vmem>>, vector<1x32x32xbf16>
    %77 = vector.shape_cast %76 : vector<1x32x32xbf16> to vector<32x32xbf16>
    %cst_71 = arith.constant dense<0.000000e+00> : vector<256x32xf32>
    %78 = tpu.matmul %75, %77, %cst_71 {dimension_numbers = #tpu.dot_dimension_numbers<[1], [0], [0], [1], [0, 0, 1, 1], [], []>} : vector<256x32xbf16>, vector<32x32xbf16>, vector<256x32xf32> -> vector<256x32xf32>
    %79 = arith.addf %72, %78 : vector<256x32xf32>
    %c0_72 = arith.constant 0 : index
    %c0_73 = arith.constant 0 : index
    %80 = vector.load %arg6[%c0_72, %c0_73] : memref<1x32xf32, #tpu.memory_space<vmem>>, vector<1x32xf32>
    %81 = vector.broadcast %80 : vector<1x32xf32> to vector<256x32xf32>
    %82 = arith.mulf %79, %81 : vector<256x32xf32>
    %c0_74 = arith.constant 0 : index
    %c0_75 = arith.constant 0 : index
    %83 = vector.load %arg7[%c0_74, %c0_75] : memref<1x32xf32, #tpu.memory_space<vmem>>, vector<1x32xf32>
    %84 = vector.broadcast %83 : vector<1x32xf32> to vector<256x32xf32>
    %85 = arith.addf %82, %84 : vector<256x32xf32>
    %cst_76 = arith.constant 0.000000e+00 : f32
    %86 = vector.broadcast %cst_76 : f32 to vector<256x32xf32>
    %87 = arith.maximumf %85, %86 : vector<256x32xf32>
    %88 = arith.truncf %87 : vector<256x32xf32> to vector<256x32xbf16>
    %c0_77 = arith.constant 0 : index
    %c0_78 = arith.constant 0 : index
    %89 = vector.load %arg8[%c0_77, %c0_78] : memref<32x128xbf16, #tpu.memory_space<vmem>>, vector<32x128xbf16>
    %cst_79 = arith.constant dense<0.000000e+00> : vector<256x128xf32>
    %90 = tpu.matmul %88, %89, %cst_79 {dimension_numbers = #tpu.dot_dimension_numbers<[1], [0], [0], [1], [0, 0, 1, 1], [], []>} : vector<256x32xbf16>, vector<32x128xbf16>, vector<256x128xf32> -> vector<256x128xf32>
    %c0_80 = arith.constant 0 : index
    %c0_81 = arith.constant 0 : index
    %91 = vector.load %arg9[%c0_80, %c0_81] : memref<1x128xf32, #tpu.memory_space<vmem>>, vector<1x128xf32>
    %92 = vector.broadcast %91 : vector<1x128xf32> to vector<256x128xf32>
    %93 = arith.mulf %90, %92 : vector<256x128xf32>
    %c0_82 = arith.constant 0 : index
    %c0_83 = arith.constant 0 : index
    %94 = vector.load %arg10[%c0_82, %c0_83] : memref<1x128xf32, #tpu.memory_space<vmem>>, vector<1x128xf32>
    %95 = vector.broadcast %94 : vector<1x128xf32> to vector<256x128xf32>
    %96 = arith.addf %93, %95 : vector<256x128xf32>
    %c0_84 = arith.constant 0 : index
    %c0_85 = arith.constant 0 : index
    %97 = vector.load %arg11[%c0_84, %c0_85] : memref<64x128xbf16, #tpu.memory_space<vmem>>, vector<64x128xbf16>
    %cst_86 = arith.constant dense<0.000000e+00> : vector<256x128xf32>
    %98 = tpu.matmul %1, %97, %cst_86 {dimension_numbers = #tpu.dot_dimension_numbers<[1], [0], [0], [1], [0, 0, 1, 1], [], []>} : vector<256x64xbf16>, vector<64x128xbf16>, vector<256x128xf32> -> vector<256x128xf32>
    %c0_87 = arith.constant 0 : index
    %c0_88 = arith.constant 0 : index
    %99 = vector.load %arg12[%c0_87, %c0_88] : memref<1x128xf32, #tpu.memory_space<vmem>>, vector<1x128xf32>
    %100 = vector.broadcast %99 : vector<1x128xf32> to vector<256x128xf32>
    %101 = arith.mulf %98, %100 : vector<256x128xf32>
    %c0_89 = arith.constant 0 : index
    %c0_90 = arith.constant 0 : index
    %102 = vector.load %arg13[%c0_89, %c0_90] : memref<1x128xf32, #tpu.memory_space<vmem>>, vector<1x128xf32>
    %103 = vector.broadcast %102 : vector<1x128xf32> to vector<256x128xf32>
    %104 = arith.addf %101, %103 : vector<256x128xf32>
    %105 = arith.addf %96, %104 : vector<256x128xf32>
    %cst_91 = arith.constant 0.000000e+00 : f32
    %106 = vector.broadcast %cst_91 : f32 to vector<256x128xf32>
    %107 = arith.maximumf %105, %106 : vector<256x128xf32>
    %c0_92 = arith.constant 0 : index
    %c0_93 = arith.constant 0 : index
    %108 = vector.load %arg14[%c0_92, %c0_93] : memref<64x256xf32, #tpu.memory_space<vmem>>, vector<64x256xf32>
    %cst_94 = arith.constant dense<0.000000e+00> : vector<64x128xf32>
    %109 = tpu.matmul %108, %107, %cst_94 {dimension_numbers = #tpu.dot_dimension_numbers<[1], [0], [0], [1], [0, 0, 1, 1], [], []>} : vector<64x256xf32>, vector<256x128xf32>, vector<64x128xf32> -> vector<64x128xf32>
    %c0_95 = arith.constant 0 : index
    %c0_96 = arith.constant 0 : index
    %c0_97 = arith.constant 0 : index
    %110 = vector.load %arg15[%c0_95, %c0_96, %c0_97] : memref<1x64x128xf32, #tpu.memory_space<vmem>>, vector<1x64x128xf32>
    %111 = vector.shape_cast %110 : vector<1x64x128xf32> to vector<64x128xf32>
    %112 = vector.shape_cast %109 : vector<64x128xf32> to vector<1x64x128xf32>
    tpu.vector_store %arg15[%c0_95, %c0_96, %c0_97], %112 {strides = array<i32>} : memref<1x64x128xf32, #tpu.memory_space<vmem>>, vector<1x64x128xf32>,
    return
  }
  func.func @transform_0(%arg0: i32) -> (i32, i32, i32) {
    %c0_i32 = arith.constant 0 : i32
    %c0_i32_0 = arith.constant 0 : i32
    %c0_i32_1 = arith.constant 0 : i32
    return %arg0, %c0_i32, %c0_i32_0 : i32, i32, i32
  }
  func.func @transform_1(%arg0: i32) -> (i32, i32) {
    %c0_i32 = arith.constant 0 : i32
    %c0_i32_0 = arith.constant 0 : i32
    %c0_i32_1 = arith.constant 0 : i32
    return %c0_i32, %c0_i32_0 : i32, i32
  }
  func.func @transform_2(%arg0: i32) -> (i32, i32) {
    %c0_i32 = arith.constant 0 : i32
    %c0_i32_0 = arith.constant 0 : i32
    %c0_i32_1 = arith.constant 0 : i32
    return %c0_i32, %c0_i32_0 : i32, i32
  }
  func.func @transform_3(%arg0: i32) -> (i32, i32) {
    %c0_i32 = arith.constant 0 : i32
    %c0_i32_0 = arith.constant 0 : i32
    %c0_i32_1 = arith.constant 0 : i32
    return %c0_i32, %c0_i32_0 : i32, i32
  }
  func.func @transform_4(%arg0: i32) -> (i32, i32, i32) {
    %c0_i32 = arith.constant 0 : i32
    %c0_i32_0 = arith.constant 0 : i32
    %c0_i32_1 = arith.constant 0 : i32
    %c0_i32_2 = arith.constant 0 : i32
    return %c0_i32, %c0_i32_0, %c0_i32_1 : i32, i32, i32
  }
  func.func @transform_5(%arg0: i32) -> (i32, i32) {
    %c0_i32 = arith.constant 0 : i32
    %c0_i32_0 = arith.constant 0 : i32
    %c0_i32_1 = arith.constant 0 : i32
    return %c0_i32, %c0_i32_0 : i32, i32
  }
  func.func @transform_6(%arg0: i32) -> (i32, i32) {
    %c0_i32 = arith.constant 0 : i32
    %c0_i32_0 = arith.constant 0 : i32
    %c0_i32_1 = arith.constant 0 : i32
    return %c0_i32, %c0_i32_0 : i32, i32
  }
  func.func @transform_7(%arg0: i32) -> (i32, i32) {
    %c0_i32 = arith.constant 0 : i32
    %c0_i32_0 = arith.constant 0 : i32
    %c0_i32_1 = arith.constant 0 : i32
    return %c0_i32, %c0_i32_0 : i32, i32
  }
  func.func @transform_8(%arg0: i32) -> (i32, i32) {
    %c0_i32 = arith.constant 0 : i32
    %c0_i32_0 = arith.constant 0 : i32
    %c0_i32_1 = arith.constant 0 : i32
    return %c0_i32, %c0_i32_0 : i32, i32
  }
  func.func @transform_9(%arg0: i32) -> (i32, i32) {
    %c0_i32 = arith.constant 0 : i32
    %c0_i32_0 = arith.constant 0 : i32
    %c0_i32_1 = arith.constant 0 : i32
    return %c0_i32, %c0_i32_0 : i32, i32
  }
  func.func @transform_10(%arg0: i32) -> (i32, i32) {
    %c0_i32 = arith.constant 0 : i32
    %c0_i32_0 = arith.constant 0 : i32
    %c0_i32_1 = arith.constant 0 : i32
    return %c0_i32, %c0_i32_0 : i32, i32
  }
  func.func @transform_11(%arg0: i32) -> (i32, i32) {
    %c0_i32 = arith.constant 0 : i32
    %c0_i32_0 = arith.constant 0 : i32
    %c0_i32_1 = arith.constant 0 : i32
    return %c0_i32, %c0_i32_0 : i32, i32
  }
  func.func @transform_12(%arg0: i32) -> (i32, i32) {
    %c0_i32 = arith.constant 0 : i32
    %c0_i32_0 = arith.constant 0 : i32
    %c0_i32_1 = arith.constant 0 : i32
    return %c0_i32, %c0_i32_0 : i32, i32
  }
  func.func @transform_13(%arg0: i32) -> (i32, i32) {
    %c0_i32 = arith.constant 0 : i32
    %c0_i32_0 = arith.constant 0 : i32
    %c0_i32_1 = arith.constant 0 : i32
    return %c0_i32, %c0_i32_0 : i32, i32
  }
  func.func @transform_14(%arg0: i32) -> (i32, i32, i32) {
    %c0_i32 = arith.constant 0 : i32
    %c0_i32_0 = arith.constant 0 : i32
    %c0_i32_1 = arith.constant 0 : i32
    return %arg0, %c0_i32, %c0_i32_0 : i32, i32, i32
  }
}

</mosaic_0001>

<bundles_post_ra>
// kernel: tpu_custom_call.1
= control target key start
LH: loop header
LB: loop body
LE: loop exit
PB: predicated region body
PF: predicated region fallthrough
CT: control target
= control target key end

     0   :  { %s7505_s0 = inlined_call_operand.vmem [shape: bf16[2,256,64], index: 0, kind: input, shape index: {}]   ;;  %s7506_s1 = inlined_call_operand.vmem [shape: bf16[64,32], index: 1, kind: input, shape index: {}]   ;;  %s7507_s2 = inlined_call_operand.vmem [shape: f32[1,32], index: 2, kind: input, shape index: {}]   ;;  %s7508_s3 = inlined_call_operand.vmem [shape: f32[1,32], index: 3, kind: input, shape index: {}]   ;;  %s7509_s4 = inlined_call_operand.vmem [shape: bf16[9,32,32], index: 4, kind: input, shape index: {}]   ;;  %s7510_s5 = inlined_call_operand.vmem [shape: f32[1,32], index: 5, kind: input, shape index: {}]   ;;  %s7511_s6 = inlined_call_operand.vmem [shape: f32[1,32], index: 6, kind: input, shape index: {}]   ;;  %s7512_s7 = inlined_call_operand.vmem [shape: bf16[32,128], index: 7, kind: input, shape index: {}]   ;;  %s7513_s8 = inlined_call_operand.vmem [shape: f32[1,128], index: 8, kind: input, shape index: {}]   ;;  %s7514_s9 = inlined_call_operand.vmem [shape: f32[1,128], index: 9, kind: input, shape index: {}]   ;;  %s7515_s10 = inlined_call_operand.vmem [shape: bf16[64,128], index: 10, kind: input, shape index: {}]   ;;  %s7516_s11 = inlined_call_operand.vmem [shape: f32[1,128], index: 11, kind: input, shape index: {}]   ;;  %s7517_s12 = inlined_call_operand.vmem [shape: f32[1,128], index: 12, kind: input, shape index: {}]   ;;  %s7518_s13 = inlined_call_operand.vmem [shape: f32[64,256], index: 13, kind: input, shape index: {}]   ;;  %s7519_s14 = inlined_call_operand.hbm [shape: f32[2,64,128], index: 14, kind: output, shape index: {}]  }
   0x1   :  { %7521 = sst [smem:[#allocation8_spill]] %s7505_s0 }
   0x2   :  { %19 = vsyncpa [#allocation4], 0 }
   0x3   :  { %21 = vsyncpa [#allocation4 + $0x1], 0  ;;  %s6222_s29 = smov 0   ;;  %s6224_s30 = smov 0  }
   0x4   :  { %s6226_s15 = smov 0   ;;  %s6228_s16 = smov 0  }
   0x5 LB: > { %7522 = sst [smem:[#allocation6_spill]] %s6137_s15  ;;  %s6243_s17 = sadd.s32 4294967295, %s6141_s16   ;;  %s6141_s16 = sphi %s6228_s16, %s7531_s16   ;;  %s6137_s15 = sphi %s6226_s15, %s7528_s15   ;;  %s6133_s30 = sphi %s6224_s30, %s7530_s30   ;;  %s6129_s29 = sphi %s6222_s29, %s7529_s29  }
   0x6   : > { %s4679_s18 = sadd.s32 4294967294, %s6141_s16   ;;  %s6247_s19 = sadd.s32 1, %s6141_s16  }
   0x7   : > { %s333_s20 = sadd.s32 1, %s6137_s15  ;;  %s330_s21 = ssub.s32 %s6141_s16, %s6247_s19 }
   0x8   : > { %p343_p0 = scmp.ne.s32.totalorder %s6137_s15, %s6133_s30  ;;  %p331_p1 = scmp.eq.s32.totalorder %s330_s21, 0 }
   0x9   : > { %p344_p2 = scmp.eq.s32.totalorder %s6243_s17, 1  ;;  %p349_p3 = scmp.ne.s32.totalorder %s6133_s30, %s6129_s29 }
   0xa   : > { %p350_p4 = scmp.eq.s32.totalorder %s4679_s18, 1  ;;  %p4682_p7 = scmp.ge.s32.totalorder %s6141_s16, 1 }
   0xb   : > { %s6258_s22 = scalar_select %p331_p1, %s6137_s15, %s333_s20  }
   0xc   : > { %p6260_p5 = por %p344_p2, %p343_p0  ;;  %p6264_p6 = por %p350_p4, %p349_p3 }
   0xd   : > { %7523 = sst [smem:[#allocation7_spill]] %s6258_s22  ;;  %p415_p8 = scmp.lt.s32.totalorder %s6141_s16, 3 }
   0xf   : > { %p416_p9 = pnand %p4682_p7, %p415_p8 }
  0x10   : > { %v6019_v0 = vld [vmem:[%s7506_s1] sm:$0xff] (!%p416_p9)   ;;  %p461_p10 = scmp.lt.s32.totalorder (!%p416_p9), %s6243_s17, 1  ;;  %v6020_v1 = vld [vmem:[%s7506_s1 + $0x8] sm:$0xff] (!%p416_p9)   ;;  %vm611_vm0 = vcmask (!%p416_p9), 523264   ;;  %v6021_v2 = vld [vmem:[%s7506_s1 + $0x10] sm:$0xff] (!%p416_p9)   ;;  %s7526_s0 = sld [smem:[#allocation8_spill]] (!%p416_p9) }
  0x11   : > { %419 = sbr.rel (%p416_p9) target bundleno = 1487 (0x5cf), region = 76  ;;  %5245 = vmatprep.subr.bf16.mxu0 (!%p416_p9), %v6019_v0  ;;  %v6022_v4 = vld [vmem:[%s7506_s1 + $0x18] sm:$0xff] (!%p416_p9)   ;;  %vm931_vm1 = vcmask (!%p416_p9), 261120   ;;  %v6143_v20 = vmov (!%p416_p9), 0.0   ;;  %vm934_vm2 = vcmask (!%p416_p9), 254976   ;;  %v6039_v21 = vld [vmem:[%s7509_s4 + $0x10] sm:$0xff] (!%p416_p9)  }
  0x12   : > { %5246 = vmatpush3.bf16.msra.mxu0 (!%p416_p9), %v6019_v0  ;;  %939 = vst.msk [vmem:[#allocation2 + $0x30] sm:$0xff] (!%p416_p9), %vm931_vm1, %v6143_v20  ;;  %940 = vst.msk [vmem:[#allocation2 + $0x38] sm:$0xff] (!%p416_p9), %vm931_vm1, %v6143_v20  ;;  %v6040_v22 = vld [vmem:[%s7509_s4 + $0x18] sm:$0xff] (!%p416_p9)   ;;  %v6385_v26 = vld [vmem:[%s7509_s4 + $0x20] sm:$0xff] (!%p416_p9)   ;;  %s4968_s20 = sshll.u32 (!%p416_p9), %s6243_s17, 10  ;;  %s6144_s15 = smov (!%p416_p9), [#allocation3]  }
  0x13   : > { %5247 = vmatprep.subr.bf16.mxu0 (!%p416_p9), %v6020_v1  ;;  %932 = vst.msk [vmem:[#allocation2] sm:$0xff] (!%p416_p9), %vm931_vm1, %v6143_v20  ;;  %933 = vst.msk [vmem:[#allocation2 + $0x8] sm:$0xff] (!%p416_p9), %vm931_vm1, %v6143_v20  ;;  %5717 = vmatprep.subr.bf16.mxu1 (!%p416_p9), %v6385_v26  ;;  %v6392_v27 = vld [vmem:[%s7509_s4 + $0x28] sm:$0xff] (!%p416_p9)   ;;  %v6399_v28 = vld [vmem:[%s7509_s4] sm:$0xff] (!%p416_p9)  }
  0x14   : > { %936 = vst.msk [vmem:[#allocation2 + $0x18] sm:$0xff] (!%p416_p9), %vm931_vm1, %v6143_v20  ;;  %937 = vst.msk [vmem:[#allocation2 + $0x20] sm:$0xff] (!%p416_p9), %vm931_vm1, %v6143_v20  ;;  %5719 = vmatpush3.bf16.msra.mxu1 (!%p416_p9), %v6385_v26  ;;  %v6404_v29 = vld [vmem:[%s7509_s4 + $0x30] sm:$0xff] (!%p416_p9)   ;;  %v6411_v30 = vld [vmem:[%s7507_s2] ss:$0 sm:$0xff] (!%p416_p9) }
  0x15   : > { %942 = vst.msk [vmem:[#allocation2 + $0x48] sm:$0xff] (!%p416_p9), %vm931_vm1, %v6143_v20  ;;  %943 = vst.msk [vmem:[#allocation2 + $0x50] sm:$0xff] (!%p416_p9), %vm931_vm1, %v6143_v20  ;;  %5718 = vmatprep.subr.bf16.mxu1 (!%p416_p9), %v6392_v27  ;;  %v6416_v32 = vld [vmem:[%s7508_s3] ss:$0 sm:$0xff] (!%p416_p9) }
  0x16   : > { %5248 = vmatpush3.bf16.msra.mxu0 (!%p416_p9), %v6020_v1  ;;  %945 = vst.msk [vmem:[#allocation2 + $0x60] sm:$0xff] (!%p416_p9), %vm931_vm1, %v6143_v20  ;;  %946 = vst.msk [vmem:[#allocation2 + $0x68] sm:$0xff] (!%p416_p9), %vm931_vm1, %v6143_v20 }
  0x17   : > { %5249 = vmatprep.subr.bf16.mxu0 (!%p416_p9), %v6021_v2  ;;  %948 = vst.msk [vmem:[#allocation2 + $0x78] sm:$0xff] (!%p416_p9), %vm931_vm1, %v6143_v20  ;;  %949 = vst.msk [vmem:[#allocation2 + $0x80] sm:$0xff] (!%p416_p9), %vm931_vm1, %v6143_v20 }
  0x18   : > { %s462_s18 = scalar_select %p461_p10, %s6243_s17, 1  ;;  %951 = vst.msk [vmem:[#allocation2 + $0x90] sm:$0xff] %vm931_vm1, %v6143_v20  ;;  %952 = vst.msk [vmem:[#allocation2 + $0x98] sm:$0xff] %vm931_vm1, %v6143_v20  ;;  %5720 = vmatpush3.bf16.msra.mxu1 %v6392_v27 }
  0x19   : > { %954 = vst.msk [vmem:[#allocation2 + $0xa8] sm:$0xff] %vm931_vm1, %v6143_v20  ;;  %955 = vst.msk [vmem:[#allocation2 + $0xb0] sm:$0xff] %vm931_vm1, %v6143_v20  ;;  %5393 = vmatprep.subr.bf16.mxu1 %v6404_v29 }
  0x1a   : > { %s4967_s22 = sshll.u32 %s462_s18, 7  ;;  %5250 = vmatpush3.bf16.msra.mxu0 %v6021_v2  ;;  %957 = vst.msk [vmem:[#allocation2 + $0xc0] sm:$0xff] %vm931_vm1, %v6143_v20  ;;  %958 = vst.msk [vmem:[#allocation2 + $0xc8] sm:$0xff] %vm931_vm1, %v6143_v20  ;;  %v1072_v23 = vld [vmem:[#allocation2 + $0x1] sm:$0xff] }
  0x1b   : > { %s6284_s26 = scalar_lea.vmem %s7526_s0, %s4967_s22  ;;  %5251 = vmatprep.subr.bf16.mxu0 %v6022_v4  ;;  %960 = vst.msk [vmem:[#allocation2 + $0xd8] sm:$0xff] %vm931_vm1, %v6143_v20  ;;  %961 = vst.msk [vmem:[#allocation2 + $0xe0] sm:$0xff] %vm931_vm1, %v6143_v20  ;;  %s458_s22 = sand.u32 1, %s6133_s30  }
  0x1c   : > { %v6023_v3 = vld [vmem:[%s6284_s26] sm:$0xff]   ;;  %v6024_v5 = vld [vmem:[%s6284_s26 + $0x8] sm:$0xff]   ;;  %v6025_v6 = vld [vmem:[%s6284_s26 + $0x10] sm:$0xff]   ;;  %963 = vst.msk [vmem:[#allocation2 + $0xf0] sm:$0xff] %vm931_vm1, %v6143_v20  ;;  %s7457_s0 = scalar_lea.hbm %s7519_s14, %s4968_s20  ;;  %s7464_s28 = scalar_lea.sflag [#allocation4], %s458_s22 }
  0x1d   : > { %5253 = vmatprep.mubr.msk.bf16.mxu0 %vm611_vm0, %v6023_v3  ;;  %v6026_v7 = vld [vmem:[%s6284_s26 + $0x18] sm:$0xff]   ;;  %v6027_v8 = vld [vmem:[%s6284_s26 + $0x20] sm:$0xff]   ;;  %v6028_v9 = vld [vmem:[%s6284_s26 + $0x28] sm:$0xff]   ;;  %964 = vst.msk [vmem:[#allocation2 + $0xf8] sm:$0xff] %vm931_vm1, %v6143_v20 }
  0x1e   : > { %5252 = vmatpush3.bf16.msra.mxu0 %v6022_v4  ;;  %v6029_v10 = vld [vmem:[%s6284_s26 + $0x30] sm:$0xff]   ;;  %v6030_v11 = vld [vmem:[%s6284_s26 + $0x38] sm:$0xff]   ;;  %v6031_v12 = vld [vmem:[%s6284_s26 + $0x40] sm:$0xff]   ;;  %966 = vst.msk [vmem:[#allocation2 + $0x108] sm:$0xff] %vm931_vm1, %v6143_v20 }
  0x1f   : > { %v6032_v13 = vld [vmem:[%s6284_s26 + $0x48] sm:$0xff]   ;;  %v6033_v14 = vld [vmem:[%s6284_s26 + $0x50] sm:$0xff]   ;;  %v6034_v15 = vld [vmem:[%s6284_s26 + $0x58] sm:$0xff]   ;;  %967 = vst.msk [vmem:[#allocation2 + $0x110] sm:$0xff] %vm931_vm1, %v6143_v20  ;;  %5285 = vmatprep.subr.bf16.mxu0 %v6039_v21 }
  0x20   : > { %v6035_v16 = vld [vmem:[%s6284_s26 + $0x60] sm:$0xff]   ;;  %v6036_v17 = vld [vmem:[%s6284_s26 + $0x68] sm:$0xff]   ;;  %v6037_v18 = vld [vmem:[%s6284_s26 + $0x70] sm:$0xff]   ;;  %969 = vst.msk [vmem:[#allocation2 + $0x120] sm:$0xff] %vm931_vm1, %v6143_v20 }
  0x21   : > { %5254 = vmatmul.mubr.msk.bf16.vlgmr.msra.gmra.mrb[0].mxu0 %vm611_vm0, %v6024_v5  ;;  %v6038_v19 = vld [vmem:[%s6284_s26 + $0x78] sm:$0xff]   ;;  %970 = vst.msk [vmem:[#allocation2 + $0x128] sm:$0xff] %vm931_vm1, %v6143_v20  ;;  %972 = vst.msk [vmem:[#allocation2 + $0x138] sm:$0xff] %vm931_vm1, %v6143_v20 }
  0x22   : > { %5257 = vmatprep.mubr.msk.bf16.mxu0 %vm611_vm0, %v6025_v6  ;;  %973 = vst.msk [vmem:[#allocation2 + $0x140] sm:$0xff] %vm931_vm1, %v6143_v20  ;;  %975 = vst.msk [vmem:[#allocation2 + $0x150] sm:$0xff] %vm931_vm1, %v6143_v20  ;;  %5286 = vmatpush3.bf16.msra.mxu0 %v6039_v21 }
  0x23   : > { %976 = vst.msk [vmem:[#allocation2 + $0x158] sm:$0xff] %vm931_vm1, %v6143_v20  ;;  %978 = vst.msk [vmem:[#allocation2 + $0x168] sm:$0xff] %vm931_vm1, %v6143_v20  ;;  %5287 = vmatprep.subr.bf16.mxu0 %v6040_v22 }
  0x24   : > { %979 = vst.msk [vmem:[#allocation2 + $0x170] sm:$0xff] %vm931_vm1, %v6143_v20  ;;  %981 = vst.msk [vmem:[#allocation2 + $0x180] sm:$0xff] %vm931_vm1, %v6143_v20 }
  0x25   : > { %982 = vst.msk [vmem:[#allocation2 + $0x188] sm:$0xff] %vm931_vm1, %v6143_v20  ;;  %984 = vst.msk [vmem:[#allocation2 + $0x198] sm:$0xff] %vm931_vm1, %v6143_v20 }
  0x26   : > { %985 = vst.msk [vmem:[#allocation2 + $0x1a0] sm:$0xff] %vm931_vm1, %v6143_v20  ;;  %5288 = vmatpush3.bf16.msra.mxu0 %v6040_v22 }
  0x27   : > { %941 = vst.msk [vmem:[#allocation2 + $0x40] sm:$0x3] %vm934_vm2, %v6143_v20  ;;  %935 = vst.msk [vmem:[#allocation2 + $0x10] sm:$0x3] %vm934_vm2, %v6143_v20  ;;  %5321 = vmatprep.subr.bf16.mxu0 %v6399_v28 }
  0x28   : > { %938 = vst.msk [vmem:[#allocation2 + $0x28] sm:$0x3] %vm934_vm2, %v6143_v20  ;;  %944 = vst.msk [vmem:[#allocation2 + $0x58] sm:$0x3] %vm934_vm2, %v6143_v20 }
  0x29   : > { %5258 = vmatmul.mubr.msk.bf16.gmra.mrb[4].mxu0 %vm611_vm0, %v6026_v7  ;;  %947 = vst.msk [vmem:[#allocation2 + $0x70] sm:$0x3] %vm934_vm2, %v6143_v20  ;;  %950 = vst.msk [vmem:[#allocation2 + $0x88] sm:$0x3] %vm934_vm2, %v6143_v20 }
  0x2a   : > { %5261 = vmatprep.mubr.msk.bf16.mxu0 %vm611_vm0, %v6027_v8  ;;  %953 = vst.msk [vmem:[#allocation2 + $0xa0] sm:$0x3] %vm934_vm2, %v6143_v20  ;;  %956 = vst.msk [vmem:[#allocation2 + $0xb8] sm:$0x3] %vm934_vm2, %v6143_v20 }
  0x2b   : > { %959 = vst.msk [vmem:[#allocation2 + $0xd0] sm:$0x3] %vm934_vm2, %v6143_v20  ;;  %962 = vst.msk [vmem:[#allocation2 + $0xe8] sm:$0x3] %vm934_vm2, %v6143_v20 }
  0x2c   : > { %965 = vst.msk [vmem:[#allocation2 + $0x100] sm:$0x3] %vm934_vm2, %v6143_v20  ;;  %968 = vst.msk [vmem:[#allocation2 + $0x118] sm:$0x3] %vm934_vm2, %v6143_v20 }
  0x2d   : > { %971 = vst.msk [vmem:[#allocation2 + $0x130] sm:$0x3] %vm934_vm2, %v6143_v20  ;;  %974 = vst.msk [vmem:[#allocation2 + $0x148] sm:$0x3] %vm934_vm2, %v6143_v20 }
  0x2e   : > { %977 = vst.msk [vmem:[#allocation2 + $0x160] sm:$0x3] %vm934_vm2, %v6143_v20  ;;  %980 = vst.msk [vmem:[#allocation2 + $0x178] sm:$0x3] %vm934_vm2, %v6143_v20  ;;  %v1073_v24 = vld [vmem:[#allocation2 + $0x9] sm:$0xff] }
  0x2f   : > { %983 = vst.msk [vmem:[#allocation2 + $0x190] sm:$0x3] %vm934_vm2, %v6143_v20  ;;  %986 = vst.msk [vmem:[#allocation2 + $0x1a8] sm:$0x3] %vm934_vm2, %v6143_v20  ;;  %v1104_v25 = vpack.c.bf16 %v1073_v24, %v1072_v23 }
  0x31   : > { %5262 = vmatmul.mubr.msk.bf16.gmra.mrb[8].mxu0 %vm611_vm0, %v6028_v9 }
  0x32   : > { %5265 = vmatprep.mubr.msk.bf16.mxu0 %vm611_vm0, %v6029_v10  ;;  %v6045_v10 = vld [vmem:[%s7509_s4 + $0x8] sm:$0xff]  }
  0x39   : > { %5266 = vmatmul.mubr.msk.bf16.gmra.mrb[12].mxu0 %vm611_vm0, %v6030_v11 }
  0x3a   : > { %5269 = vmatprep.mubr.msk.bf16.mxu0 %vm611_vm0, %v6031_v12 }
  0x41   : > { %5270 = vmatmul.mubr.msk.bf16.gmra.mrb[16].mxu0 %vm611_vm0, %v6032_v13 }
  0x42   : > { %5273 = vmatprep.mubr.msk.bf16.mxu0 %vm611_vm0, %v6033_v14 }
  0x49   : > { %5274 = vmatmul.mubr.msk.bf16.gmra.mrb[20].mxu0 %vm611_vm0, %v6034_v15 }
  0x4a   : > { %5277 = vmatprep.mubr.msk.bf16.mxu0 %vm611_vm0, %v6035_v16 }
  0x51   : > { %5278 = vmatmul.mubr.msk.bf16.gmra.mrb[24].mxu0 %vm611_vm0, %v6036_v17 }
  0x52   : > { %5281 = vmatprep.mubr.msk.bf16.mxu0 %vm611_vm0, %v6037_v18 }
  0x59   : > { %5282 = vmatmul.mubr.msk.bf16.gmra.mrb[28].mxu0 %vm611_vm0, %v6038_v19 }
  0x5a   : > { %5289 = vmatprep.mubr.msk.bf16.mxu0 %vm931_vm1, %v1104_v25 }
  0xf4   : > { %v5255_v31 = vpop.f32.mrb[0].mxu0 }
  0xf5   : > { %v830_v33 = vmul.f32 %v5255_v31, %v6411_v30  ;;  %v694_v34 = vpop.f32.mrb[1].mxu0 }
  0xf6   : > { %v828_v35 = vmul.f32 %v6411_v30, %v694_v34  ;;  %v5256_v36 = vpop.f32.mrb[2].mxu0 }
  0xf7   : > { %v869_v37 = vadd.f32 %v6416_v32, %v830_v33  ;;  %v831_v38 = vmul.f32 %v5256_v36, %v6411_v30  ;;  %v697_v39 = vpop.f32.mrb[3].mxu0 }
  0xf8   : > { %v867_v40 = vadd.f32 %v6416_v32, %v828_v35  ;;  %v829_v41 = vmul.f32 %v6411_v30, %v697_v39 }
  0xf9   : > { %v901_v42 = vmax.f32 %v869_v37, 0.0  ;;  %v870_v43 = vadd.f32 %v6416_v32, %v831_v38 }
  0xfa   : > { %v899_v44 = vmax.f32 %v867_v40, 0.0  ;;  %v868_v45 = vadd.f32 %v6416_v32, %v829_v41 }
  0xfb   : > { %990 = vst.msk [vmem:[#allocation2 + $0x31] sm:$0xff] %vm931_vm1, %v901_v42  ;;  %v902_v46 = vmax.f32 %v870_v43, 0.0 }
  0xfc   : > { %988 = vst.msk [vmem:[#allocation2 + $0x19] sm:$0xff] %vm931_vm1, %v899_v44  ;;  %v900_v47 = vmax.f32 %v868_v45, 0.0  ;;  %v5259_v48 = vpop.f32.mrb[4].mxu0 }
  0xfd   : > { %991 = vst.msk [vmem:[#allocation2 + $0x39] sm:$0xff] %vm931_vm1, %v902_v46  ;;  %v834_v49 = vmul.f32 %v5259_v48, %v6411_v30  ;;  %v710_v50 = vpop.f32.mrb[5].mxu0 }
  0xfe   : > { %989 = vst.msk [vmem:[#allocation2 + $0x21] sm:$0xff] %vm931_vm1, %v900_v47  ;;  %v832_v51 = vmul.f32 %v6411_v30, %v710_v50  ;;  %v5260_v52 = vpop.f32.mrb[6].mxu0 }
  0xff   : > { %v873_v53 = vadd.f32 %v6416_v32, %v834_v49  ;;  %v835_v54 = vmul.f32 %v5260_v52, %v6411_v30  ;;  %v713_v55 = vpop.f32.mrb[7].mxu0 }
 0x100   : > { %v871_v56 = vadd.f32 %v6416_v32, %v832_v51  ;;  %v833_v57 = vmul.f32 %v6411_v30, %v713_v55 }
 0x101   : > { %v905_v58 = vmax.f32 %v873_v53, 0.0  ;;  %v874_v59 = vadd.f32 %v6416_v32, %v835_v54 }
 0x102   : > { %v903_v60 = vmax.f32 %v871_v56, 0.0  ;;  %v872_v61 = vadd.f32 %v6416_v32, %v833_v57  ;;  %v1076_v9 = vld [vmem:[#allocation2 + $0x31] sm:$0xff] }
 0x103   : > { %994 = vst.msk [vmem:[#allocation2 + $0x61] sm:$0xff] %vm931_vm1, %v905_v58  ;;  %v906_v62 = vmax.f32 %v874_v59, 0.0  ;;  %v1074_v4 = vld [vmem:[#allocation2 + $0x19] sm:$0xff] }
 0x104   : > { %992 = vst.msk [vmem:[#allocation2 + $0x49] sm:$0xff] %vm931_vm1, %v903_v60  ;;  %v904_v63 = vmax.f32 %v872_v61, 0.0  ;;  %v5263_v0 = vpop.f32.mrb[8].mxu0  ;;  %v1077_v1 = vld [vmem:[#allocation2 + $0x39] sm:$0xff] }
 0x105   : > { %995 = vst.msk [vmem:[#allocation2 + $0x69] sm:$0xff] %vm931_vm1, %v906_v62  ;;  %v838_v2 = vmul.f32 %v5263_v0, %v6411_v30  ;;  %v726_v3 = vpop.f32.mrb[9].mxu0  ;;  %v1075_v5 = vld [vmem:[#allocation2 + $0x21] sm:$0xff]  ;;  %v6451_v14 = vpack.c.bf16 %v1077_v1, %v1076_v9 }
 0x106   : > { %993 = vst.msk [vmem:[#allocation2 + $0x51] sm:$0xff] %vm931_vm1, %v904_v63  ;;  %v836_v6 = vmul.f32 %v6411_v30, %v726_v3  ;;  %v5264_v7 = vpop.f32.mrb[10].mxu0  ;;  %v6444_v8 = vpack.c.bf16 %v1075_v5, %v1074_v4 }
 0x107   : > { %v877_v11 = vadd.f32 %v6416_v32, %v838_v2  ;;  %v839_v12 = vmul.f32 %v5264_v7, %v6411_v30  ;;  %v729_v13 = vpop.f32.mrb[11].mxu0 }
 0x108   : > { %v875_v15 = vadd.f32 %v6416_v32, %v836_v6  ;;  %v837_v16 = vmul.f32 %v6411_v30, %v729_v13  ;;  %5290 = vmatmul.mubr.msk.bf16.vlgmr.msra.gmra.mrb[32].mxu0 %vm931_vm1, %v6444_v8 }
 0x109   : > { %v909_v17 = vmax.f32 %v877_v11, 0.0  ;;  %v878_v18 = vadd.f32 %v6416_v32, %v839_v12  ;;  %5293 = vmatprep.mubr.msk.bf16.mxu0 %vm931_vm1, %v6451_v14  ;;  %5322 = vmatpush3.bf16.msra.mxu0 %v6399_v28 }
 0x10a   : > { %v907_v19 = vmax.f32 %v875_v15, 0.0  ;;  %v876_v20 = vadd.f32 %v6416_v32, %v837_v16  ;;  %5323 = vmatprep.subr.bf16.mxu0 %v6045_v10  ;;  %v1080_v37 = vld [vmem:[#allocation2 + $0x61] sm:$0xff] }
 0x10b   : > { %998 = vst.msk [vmem:[#allocation2 + $0x91] sm:$0xff] %vm931_vm1, %v909_v17  ;;  %v910_v21 = vmax.f32 %v878_v18, 0.0  ;;  %v1078_v33 = vld [vmem:[#allocation2 + $0x49] sm:$0xff] }
 0x10c   : > { %996 = vst.msk [vmem:[#allocation2 + $0x79] sm:$0xff] %vm931_vm1, %v907_v19  ;;  %v908_v22 = vmax.f32 %v876_v20, 0.0  ;;  %v5267_v23 = vpop.f32.mrb[12].mxu0  ;;  %v1081_v24 = vld [vmem:[#allocation2 + $0x69] sm:$0xff] }
 0x10d   : > { %999 = vst.msk [vmem:[#allocation2 + $0x99] sm:$0xff] %vm931_vm1, %v910_v21  ;;  %v842_v25 = vmul.f32 %v5267_v23, %v6411_v30  ;;  %v742_v31 = vpop.f32.mrb[13].mxu0  ;;  %v1079_v34 = vld [vmem:[#allocation2 + $0x51] sm:$0xff]  ;;  %5324 = vmatpush3.bf16.msra.mxu0 %v6045_v10  ;;  %v6473_v41 = vpack.c.bf16 %v1081_v24, %v1080_v37 }
 0x10e   : > { %997 = vst.msk [vmem:[#allocation2 + $0x81] sm:$0xff] %vm931_vm1, %v908_v22  ;;  %v840_v28 = vmul.f32 %v6411_v30, %v742_v31  ;;  %v5268_v35 = vpop.f32.mrb[14].mxu0  ;;  %v6468_v36 = vpack.c.bf16 %v1079_v34, %v1078_v33  ;;  %5357 = vmatprep.subr.bf16.mxu0 %v6385_v26 }
 0x10f   : > { %v881_v38 = vadd.f32 %v6416_v32, %v842_v25  ;;  %v843_v39 = vmul.f32 %v5268_v35, %v6411_v30  ;;  %v745_v40 = vpop.f32.mrb[15].mxu0 }
 0x110   : > { %v879_v42 = vadd.f32 %v6416_v32, %v840_v28  ;;  %v841_v43 = vmul.f32 %v6411_v30, %v745_v40  ;;  %5294 = vmatmul.mubr.msk.bf16.gmra.mrb[36].mxu0 %vm931_vm1, %v6468_v36 }
 0x111   : > { %v913_v44 = vmax.f32 %v881_v38, 0.0  ;;  %v882_v45 = vadd.f32 %v6416_v32, %v843_v39  ;;  %5297 = vmatprep.mubr.msk.bf16.mxu0 %vm931_vm1, %v6473_v41 }
 0x112   : > { %v911_v46 = vmax.f32 %v879_v42, 0.0  ;;  %v880_v47 = vadd.f32 %v6416_v32, %v841_v43  ;;  %v1084_v59 = vld [vmem:[#allocation2 + $0x91] sm:$0xff] }
 0x113   : > { %1002 = vst.msk [vmem:[#allocation2 + $0xc1] sm:$0xff] %vm931_vm1, %v913_v44  ;;  %v914_v48 = vmax.f32 %v882_v45, 0.0  ;;  %v1082_v54 = vld [vmem:[#allocation2 + $0x79] sm:$0xff] }
 0x114   : > { %1000 = vst.msk [vmem:[#allocation2 + $0xa9] sm:$0xff] %vm931_vm1, %v911_v46  ;;  %v912_v49 = vmax.f32 %v880_v47, 0.0  ;;  %v5271_v50 = vpop.f32.mrb[16].mxu0  ;;  %v1085_v51 = vld [vmem:[#allocation2 + $0x99] sm:$0xff] }
 0x115   : > { %1003 = vst.msk [vmem:[#allocation2 + $0xc9] sm:$0xff] %vm931_vm1, %v914_v48  ;;  %v846_v52 = vmul.f32 %v5271_v50, %v6411_v30  ;;  %v758_v53 = vpop.f32.mrb[17].mxu0  ;;  %v1083_v55 = vld [vmem:[#allocation2 + $0x81] sm:$0xff]  ;;  %v6493_v63 = vpack.c.bf16 %v1085_v51, %v1084_v59 }
 0x116   : > { %1001 = vst.msk [vmem:[#allocation2 + $0xb1] sm:$0xff] %vm931_vm1, %v912_v49  ;;  %v844_v56 = vmul.f32 %v6411_v30, %v758_v53  ;;  %v5272_v57 = vpop.f32.mrb[18].mxu0  ;;  %v6489_v58 = vpack.c.bf16 %v1083_v55, %v1082_v54 }
 0x117   : > { %v885_v60 = vadd.f32 %v6416_v32, %v846_v52  ;;  %v847_v61 = vmul.f32 %v5272_v57, %v6411_v30  ;;  %v761_v62 = vpop.f32.mrb[19].mxu0 }
 0x118   : > { %v883_v0 = vadd.f32 %v6416_v32, %v844_v56  ;;  %v845_v1 = vmul.f32 %v6411_v30, %v761_v62  ;;  %5298 = vmatmul.mubr.msk.bf16.gmra.mrb[40].mxu0 %vm931_vm1, %v6489_v58 }
 0x119   : > { %v917_v2 = vmax.f32 %v885_v60, 0.0  ;;  %v886_v3 = vadd.f32 %v6416_v32, %v847_v61  ;;  %5301 = vmatprep.mubr.msk.bf16.mxu0 %vm931_vm1, %v6493_v63 }
 0x11a   : > { %v915_v4 = vmax.f32 %v883_v0, 0.0  ;;  %v884_v5 = vadd.f32 %v6416_v32, %v845_v1  ;;  %v1088_v19 = vld [vmem:[#allocation2 + $0xc1] sm:$0xff] }
 0x11b   : > { %1006 = vst.msk [vmem:[#allocation2 + $0xf1] sm:$0xff] %vm931_vm1, %v917_v2  ;;  %v918_v6 = vmax.f32 %v886_v3, 0.0  ;;  %v1086_v13 = vld [vmem:[#allocation2 + $0xa9] sm:$0xff] }
 0x11c   : > { %1004 = vst.msk [vmem:[#allocation2 + $0xd9] sm:$0xff] %vm931_vm1, %v915_v4  ;;  %v916_v7 = vmax.f32 %v884_v5, 0.0  ;;  %v5275_v9 = vpop.f32.mrb[20].mxu0  ;;  %v1089_v10 = vld [vmem:[#allocation2 + $0xc9] sm:$0xff] }
 0x11d   : > { %1007 = vst.msk [vmem:[#allocation2 + $0xf9] sm:$0xff] %vm931_vm1, %v918_v6  ;;  %v850_v11 = vmul.f32 %v5275_v9, %v6411_v30  ;;  %v774_v12 = vpop.f32.mrb[21].mxu0  ;;  %v1087_v15 = vld [vmem:[#allocation2 + $0xb1] sm:$0xff]  ;;  %v6513_v23 = vpack.c.bf16 %v1089_v10, %v1088_v19 }
 0x11e   : > { %1005 = vst.msk [vmem:[#allocation2 + $0xe1] sm:$0xff] %vm931_vm1, %v916_v7  ;;  %v848_v16 = vmul.f32 %v6411_v30, %v774_v12  ;;  %v5276_v17 = vpop.f32.mrb[22].mxu0  ;;  %v6509_v18 = vpack.c.bf16 %v1087_v15, %v1086_v13 }
 0x11f   : > { %v889_v20 = vadd.f32 %v6416_v32, %v850_v11  ;;  %v851_v21 = vmul.f32 %v5276_v17, %v6411_v30  ;;  %v777_v22 = vpop.f32.mrb[23].mxu0 }
 0x120   : > { %v887_v24 = vadd.f32 %v6416_v32, %v848_v16  ;;  %v849_v25 = vmul.f32 %v6411_v30, %v777_v22  ;;  %5302 = vmatmul.mubr.msk.bf16.gmra.mrb[44].mxu0 %vm931_vm1, %v6509_v18 }
 0x121   : > { %v921_v31 = vmax.f32 %v889_v20, 0.0  ;;  %v890_v33 = vadd.f32 %v6416_v32, %v851_v21  ;;  %5305 = vmatprep.mubr.msk.bf16.mxu0 %vm931_vm1, %v6513_v23 }
 0x122   : > { %v919_v34 = vmax.f32 %v887_v24, 0.0  ;;  %v888_v28 = vadd.f32 %v6416_v32, %v849_v25  ;;  %v1092_v51 = vld [vmem:[#allocation2 + $0xf1] sm:$0xff] }
 0x123   : > { %1010 = vst.msk [vmem:[#allocation2 + $0x121] sm:$0xff] %vm931_vm1, %v921_v31  ;;  %v922_v35 = vmax.f32 %v890_v33, 0.0  ;;  %v1090_v46 = vld [vmem:[#allocation2 + $0xd9] sm:$0xff] }
 0x124   : > { %1008 = vst.msk [vmem:[#allocation2 + $0x109] sm:$0xff] %vm931_vm1, %v919_v34  ;;  %v920_v37 = vmax.f32 %v888_v28, 0.0  ;;  %v5279_v38 = vpop.f32.mrb[24].mxu0  ;;  %v1587_v39 = vld [vmem:[#allocation2 + $0xf2] sm:$0xff]  ;;  %v1588_v40 = vld [vmem:[#allocation2 + $0xfa] sm:$0xff] }
 0x125   : > { %v1093_v42 = vld [vmem:[#allocation2 + $0xf9] sm:$0xff]  ;;  %1011 = vst.msk [vmem:[#allocation2 + $0x129] sm:$0xff] %vm931_vm1, %v922_v35  ;;  %v854_v43 = vmul.f32 %v5279_v38, %v6411_v30  ;;  %v790_v44 = vpop.f32.mrb[25].mxu0  ;;  %v6527_v45 = vpack.c.bf16 %v1588_v40, %v1587_v39  ;;  %v1091_v47 = vld [vmem:[#allocation2 + $0xe1] sm:$0xff] }
 0x126   : > { %1009 = vst.msk [vmem:[#allocation2 + $0x111] sm:$0xff] %vm931_vm1, %v920_v37  ;;  %v852_v48 = vmul.f32 %v6411_v30, %v790_v44  ;;  %v5280_v49 = vpop.f32.mrb[26].mxu0  ;;  %v6531_v50 = vpack.c.bf16 %v1091_v47, %v1090_v46  ;;  %v6537_v55 = vpack.c.bf16 %v1093_v42, %v1092_v51  ;;  %v6046_v31 = vld [vmem:[%s7509_s4 + $0x38] sm:$0xff]   ;;  %v6047_v40 = vld [vmem:[%s7509_s4 + $0x40] sm:$0xff]  }
 0x127   : > { %v893_v52 = vadd.f32 %v6416_v32, %v854_v43  ;;  %v855_v53 = vmul.f32 %v5280_v49, %v6411_v30  ;;  %v793_v54 = vpop.f32.mrb[27].mxu0  ;;  %5381 = vmatprep.mubr.msk.bf16.mxu1 %vm931_vm1, %v6527_v45 }
 0x128   : > { %v891_v56 = vadd.f32 %v6416_v32, %v852_v48  ;;  %v853_v57 = vmul.f32 %v6411_v30, %v793_v54  ;;  %5306 = vmatmul.mubr.msk.bf16.gmra.mrb[48].mxu0 %vm931_vm1, %v6531_v50  ;;  %v1020_v54 = vld [vmem:[#allocation2] sm:$0xff] }
 0x129   : > { %v925_v59 = vmax.f32 %v893_v52, 0.0  ;;  %v894_v60 = vadd.f32 %v6416_v32, %v855_v53  ;;  %5309 = vmatprep.mubr.msk.bf16.mxu0 %vm931_vm1, %v6537_v55 }
 0x12a   : > { %v923_v61 = vmax.f32 %v891_v56, 0.0  ;;  %v892_v62 = vadd.f32 %v6416_v32, %v853_v57  ;;  %v1096_v19 = vld [vmem:[#allocation2 + $0x121] sm:$0xff] }
 0x12b   : > { %1014 = vst.msk [vmem:[#allocation2 + $0x151] sm:$0xff] %vm931_vm1, %v925_v59  ;;  %v926_v0 = vmax.f32 %v894_v60, 0.0  ;;  %v1094_v1 = vld [vmem:[#allocation2 + $0x109] sm:$0xff]  ;;  %v1874_v59 = vld [vmem:[#allocation2 + $0x20] sm:$0xff] }
 0x12c   : > { %1012 = vst.msk [vmem:[#allocation2 + $0x139] sm:$0xff] %vm931_vm1, %v923_v61  ;;  %v924_v2 = vmax.f32 %v892_v62, 0.0  ;;  %v5283_v3 = vpop.f32.mrb[28].mxu0  ;;  %v1097_v4 = vld [vmem:[#allocation2 + $0x129] sm:$0xff] }
 0x12d   : > { %v1591_v5 = vld [vmem:[#allocation2 + $0x122] sm:$0xff]  ;;  %v1592_v6 = vld [vmem:[#allocation2 + $0x12a] sm:$0xff]  ;;  %1015 = vst.msk [vmem:[#allocation2 + $0x159] sm:$0xff] %vm931_vm1, %v926_v0  ;;  %v858_v7 = vmul.f32 %v5283_v3, %v6411_v30  ;;  %v806_v9 = vpop.f32.mrb[29].mxu0  ;;  %v1590_v12 = vld [vmem:[#allocation2 + $0x112] sm:$0xff]  ;;  %v6559_v24 = vpack.c.bf16 %v1097_v4, %v1096_v19 }
 0x12e   : > { %v1095_v10 = vld [vmem:[#allocation2 + $0x111] sm:$0xff]  ;;  %1013 = vst.msk [vmem:[#allocation2 + $0x141] sm:$0xff] %vm931_vm1, %v924_v2  ;;  %v856_v13 = vmul.f32 %v6411_v30, %v806_v9  ;;  %v5284_v15 = vpop.f32.mrb[30].mxu0  ;;  %v6561_v25 = vpack.c.bf16 %v1592_v6, %v1591_v5  ;;  %v1021_v56 = vld [vmem:[#allocation2 + $0x8] sm:$0xff]  ;;  %v1882_v19 = vld [vmem:[#allocation2 + $0x80] sm:$0xff] }
 0x12f   : > { %v1589_v11 = vld [vmem:[#allocation2 + $0x10a] sm:$0xff]  ;;  %v6553_v16 = vpack.c.bf16 %v1095_v10, %v1094_v1  ;;  %v897_v20 = vadd.f32 %v6416_v32, %v858_v7  ;;  %v859_v21 = vmul.f32 %v5284_v15, %v6411_v30  ;;  %v809_v22 = vpop.f32.mrb[31].mxu0  ;;  %v1052_v0 = vpack.c.bf16 %v1021_v56, %v1020_v54  ;;  %v1873_v3 = vld [vmem:[#allocation2 + $0x18] sm:$0xff]  ;;  %v1895_v56 = vld [vmem:[#allocation2 + $0x120] sm:$0xff] }
 0x130   : > { %v6555_v17 = vpack.c.bf16 %v1590_v12, %v1589_v11  ;;  %v895_v33 = vadd.f32 %v6416_v32, %v856_v13  ;;  %v857_v34 = vmul.f32 %v6411_v30, %v809_v22  ;;  %v1905_v4 = vpack.c.bf16 %v1874_v59, %v1873_v3  ;;  %v1876_v5 = vld [vmem:[#allocation2 + $0x38] sm:$0xff]  ;;  %v1878_v6 = vld [vmem:[#allocation2 + $0x50] sm:$0xff]  ;;  %v1877_v10 = vld [vmem:[#allocation2 + $0x48] sm:$0xff] }
 0x131   : > { %5310 = vmatmul.mubr.msk.bf16.gmra.mrb[52].mxu0 %vm931_vm1, %v6553_v16  ;;  %v929_v28 = vmax.f32 %v897_v20, 0.0  ;;  %v898_v35 = vadd.f32 %v6416_v32, %v859_v21  ;;  %v1875_v7 = vld [vmem:[#allocation2 + $0x30] sm:$0xff]  ;;  %v6614_v11 = vpack.c.bf16 %v1878_v6, %v1877_v10  ;;  %v6048_v12 = vld [vmem:[%s7509_s4 + $0x48] sm:$0xff]   ;;  %v1879_v20 = vld [vmem:[#allocation2 + $0x60] sm:$0xff] }
 0x132   : > { %5382 = vmatmul.mubr.msk.bf16.vlgmr.msra.gmra.mrb[0].mxu1 %vm931_vm1, %v6555_v17  ;;  %5313 = vmatprep.mubr.msk.bf16.mxu0 %vm931_vm1, %v6559_v24  ;;  %v927_v37 = vmax.f32 %v895_v33, 0.0  ;;  %v896_v38 = vadd.f32 %v6416_v32, %v857_v34  ;;  %v1100_v51 = vld [vmem:[#allocation2 + $0x151] sm:$0xff]  ;;  %v6612_v9 = vpack.c.bf16 %v1876_v5, %v1875_v7  ;;  %v1880_v13 = vld [vmem:[#allocation2 + $0x68] sm:$0xff] }
 0x133   : > { %5385 = vmatprep.mubr.msk.bf16.mxu1 %vm931_vm1, %v6561_v25  ;;  %5394 = vmatpush3.bf16.msra.mxu1 %v6404_v29  ;;  %1018 = vst.msk [vmem:[#allocation2 + $0x181] sm:$0xff] %vm931_vm1, %v929_v28  ;;  %v930_v30 = vmax.f32 %v898_v35, 0.0  ;;  %v1098_v39 = vld [vmem:[#allocation2 + $0x139] sm:$0xff]  ;;  %v6631_v15 = vld [vmem:[%s7509_s4 + $0x50] sm:$0xff]   ;;  %v6633_v21 = vpack.c.bf16 %v1880_v13, %v1879_v20  ;;  %v1885_v28 = vld [vmem:[#allocation2 + $0xa8] sm:$0xff] }
 0x134   : > { %5395 = vmatprep.subr.bf16.mxu1 %v6046_v31  ;;  %1016 = vst.msk [vmem:[#allocation2 + $0x169] sm:$0xff] %vm931_vm1, %v927_v37  ;;  %v928_v42 = vmax.f32 %v896_v38, 0.0  ;;  %v1101_v43 = vld [vmem:[#allocation2 + $0x159] sm:$0xff]  ;;  %v1886_v33 = vld [vmem:[#allocation2 + $0xb0] sm:$0xff]  ;;  %v1888_v37 = vld [vmem:[#allocation2 + $0xc8] sm:$0xff] }
 0x135   : > { %v1595_v44 = vld [vmem:[#allocation2 + $0x152] sm:$0xff]  ;;  %v1596_v46 = vld [vmem:[#allocation2 + $0x15a] sm:$0xff]  ;;  %1019 = vst.msk [vmem:[#allocation2 + $0x189] sm:$0xff] %vm931_vm1, %v930_v30  ;;  %v1594_v29 = vld [vmem:[#allocation2 + $0x142] sm:$0xff]  ;;  %v6590_v52 = vpack.c.bf16 %v1101_v43, %v1100_v51  ;;  %v6649_v35 = vpack.c.bf16 %v1886_v33, %v1885_v28 }
 0x136   : > { %v1099_v32 = vld [vmem:[#allocation2 + $0x141] sm:$0xff]  ;;  %1017 = vst.msk [vmem:[#allocation2 + $0x171] sm:$0xff] %vm931_vm1, %v928_v42  ;;  %v6592_v53 = vpack.c.bf16 %v1596_v46, %v1595_v44  ;;  %v1881_v22 = vld [vmem:[#allocation2 + $0x78] sm:$0xff]  ;;  %v1894_v44 = vld [vmem:[#allocation2 + $0x110] sm:$0xff] }
 0x137   : > { %v1593_v47 = vld [vmem:[#allocation2 + $0x13a] sm:$0xff]  ;;  %v6586_v48 = vpack.c.bf16 %v1099_v32, %v1098_v39  ;;  %5396 = vmatpush3.bf16.msra.mxu1 %v6046_v31  ;;  %v6636_v31 = vpack.c.bf16 %v1882_v19, %v1881_v22  ;;  %v1891_v46 = vld [vmem:[#allocation2 + $0xf0] sm:$0xff]  ;;  %v1896_v51 = vld [vmem:[#allocation2 + $0x128] sm:$0xff] }
 0x138   : > { %v6588_v49 = vpack.c.bf16 %v1594_v29, %v1593_v47  ;;  %5429 = vmatprep.subr.bf16.mxu1 %v6047_v40  ;;  %v1890_v38 = vld [vmem:[#allocation2 + $0xe0] sm:$0xff]  ;;  %v1892_v43 = vld [vmem:[#allocation2 + $0xf8] sm:$0xff]  ;;  %v1893_v47 = vld [vmem:[#allocation2 + $0x108] sm:$0xff] }
 0x139   : > { %5314 = vmatmul.mubr.msk.bf16.gmra.mrb[56].mxu0 %vm931_vm1, %v6586_v48  ;;  %v1887_v30 = vld [vmem:[#allocation2 + $0xc0] sm:$0xff]  ;;  %v6671_v32 = vpack.c.bf16 %v1892_v43, %v1891_v46  ;;  %v6673_v29 = vpack.c.bf16 %v1894_v44, %v1893_v47  ;;  %v1897_v59 = vld [vmem:[#allocation2 + $0x138] sm:$0xff]  ;;  %v1568_v7 = vld [vmem:[#allocation2 + $0xa] sm:$0xff] }
 0x13a   : > { %5386 = vmatmul.mubr.msk.bf16.gmra.mrb[4].mxu1 %vm931_vm1, %v6588_v49  ;;  %5317 = vmatprep.mubr.msk.bf16.mxu0 %vm931_vm1, %v6590_v52  ;;  %v6659_v39 = vpack.c.bf16 %v1888_v37, %v1887_v30  ;;  %v1898_v54 = vld [vmem:[#allocation2 + $0x140] sm:$0xff]  ;;  %v6050_v37 = vld [vmem:[%s7509_s4 + $0x58] sm:$0xff]   ;;  %v1576_v43 = vld [vmem:[#allocation2 + $0x6a] sm:$0xff] }
 0x13b   : > { %5389 = vmatprep.mubr.msk.bf16.mxu1 %vm931_vm1, %v6592_v53  ;;  %v1102_v57 = vld [vmem:[#allocation2 + $0x169] sm:$0xff]  ;;  %v1569_v20 = vld [vmem:[#allocation2 + $0x1a] sm:$0xff]  ;;  %v1579_v46 = vld [vmem:[#allocation2 + $0x92] sm:$0xff] }
 0x13c   : > { %v1567_v6 = vld [vmem:[#allocation2 + $0x2] sm:$0xff]  ;;  %v1572_v33 = vld [vmem:[#allocation2 + $0x3a] sm:$0xff] }
 0x13d   : > { %v1103_v60 = vld [vmem:[#allocation2 + $0x171] sm:$0xff]  ;;  %v1904_v10 = vld [vmem:[#allocation2 + $0x188] sm:$0xff]  ;;  %v1599_v13 = vpack.c.bf16 %v1568_v7, %v1567_v6  ;;  %v6051_v30 = vld [vmem:[%s7509_s4 + $0x60] sm:$0xff]  }
 0x13e   : > { %v1597_v61 = vld [vmem:[#allocation2 + $0x16a] sm:$0xff]  ;;  %v1598_v62 = vld [vmem:[#allocation2 + $0x172] sm:$0xff]  ;;  %v6602_v1 = vpack.c.bf16 %v1103_v60, %v1102_v57  ;;  %v6683_v57 = vpack.c.bf16 %v1896_v51, %v1895_v56  ;;  %v6685_v60 = vpack.c.bf16 %v1898_v54, %v1897_v59  ;;  %v1570_v22 = vld [vmem:[#allocation2 + $0x22] sm:$0xff] }
 0x13f   : > { %v6604_v2 = vpack.c.bf16 %v1598_v62, %v1597_v61  ;;  %v1900_v61 = vld [vmem:[#allocation2 + $0x158] sm:$0xff]  ;;  %v1902_v62 = vld [vmem:[#allocation2 + $0x170] sm:$0xff]  ;;  %v1583_v56 = vld [vmem:[#allocation2 + $0xc2] sm:$0xff] }
 0x140   : > { %v1580_v47 = vld [vmem:[#allocation2 + $0x9a] sm:$0xff]  ;;  %v1584_v59 = vld [vmem:[#allocation2 + $0xca] sm:$0xff] }
 0x141   : > { %5318 = vmatmul.mubr.msk.bf16.gmra.mrb[60].mxu0 %vm931_vm1, %v6602_v1  ;;  %v6746_v54 = vpack.c.bf16 %v1580_v47, %v1579_v46  ;;  %v3107_v7 = vld [vmem:[#allocation2 + $0x99] sm:$0xff]  ;;  %v3113_v46 = vld [vmem:[#allocation2 + $0xe1] sm:$0xff] }
 0x142   : > { %5390 = vmatmul.mubr.msk.bf16.gmra.mrb[8].mxu1 %vm931_vm1, %v6604_v2  ;;  %5325 = vmatprep.mubr.msk.bf16.mxu0 %vm931_vm1, %v1052_v0  ;;  %v1899_v0 = vld [vmem:[#allocation2 + $0x150] sm:$0xff] }
 0x143   : > { %5397 = vmatprep.mubr.msk.bf16.mxu1 %vm931_vm1, %v1905_v4  ;;  %v6695_v3 = vpack.c.bf16 %v1900_v61, %v1899_v0 }
 0x149   : > { %5326 = vmatmul.mubr.msk.bf16.vlgmr.msra.gmra.mrb[32].mxu0 %vm931_vm1, %v1905_v4  ;;  %v1901_v4 = vld [vmem:[#allocation2 + $0x168] sm:$0xff] }
 0x14a   : > { %5398 = vmatmul.mubr.msk.bf16.vlgmr.msra.gmra.mrb[12].mxu1 %vm931_vm1, %v6612_v9  ;;  %5329 = vmatprep.mubr.msk.bf16.mxu0 %vm931_vm1, %v6612_v9  ;;  %v6697_v5 = vpack.c.bf16 %v1902_v62, %v1901_v4  ;;  %v6758_v62 = vpack.c.bf16 %v1584_v59, %v1583_v56  ;;  %v3112_v56 = vld [vmem:[#allocation2 + $0xd9] sm:$0xff] }
 0x14b   : > { %5401 = vmatprep.mubr.msk.bf16.mxu1 %vm931_vm1, %v6614_v11  ;;  %5430 = vmatpush3.bf16.msra.mxu1 %v6047_v40  ;;  %v1889_v40 = vld [vmem:[#allocation2 + $0xd8] sm:$0xff] }
 0x14c   : > { %5358 = vmatpush3.bf16.msra.mxu0 %v6385_v26  ;;  %5431 = vmatprep.subr.bf16.mxu1 %v6048_v12  ;;  %v1884_v26 = vld [vmem:[#allocation2 + $0x98] sm:$0xff]  ;;  %v6661_v42 = vpack.c.bf16 %v1890_v38, %v1889_v40  ;;  %v1575_v40 = vld [vmem:[#allocation2 + $0x62] sm:$0xff] }
 0x14d   : > { %5359 = vmatprep.subr.bf16.mxu0 %v6392_v27  ;;  %v1574_v38 = vld [vmem:[#allocation2 + $0x52] sm:$0xff] }
 0x14f   : > { %5432 = vmatpush3.bf16.msra.mxu1 %v6048_v12  ;;  %v1903_v12 = vld [vmem:[#allocation2 + $0x180] sm:$0xff] }
 0x150   : > { %5360 = vmatpush3.bf16.msra.mxu0 %v6392_v27  ;;  %5465 = vmatprep.subr.bf16.mxu1 %v6631_v15  ;;  %v1883_v27 = vld [vmem:[#allocation2 + $0x90] sm:$0xff]  ;;  %v6707_v19 = vpack.c.bf16 %v1904_v10, %v1903_v12  ;;  %v3104_v12 = vld [vmem:[#allocation2 + $0x79] sm:$0xff] }
 0x151   : > { %5330 = vmatmul.mubr.msk.bf16.gmra.mrb[36].mxu0 %vm931_vm1, %v6614_v11  ;;  %v6647_v34 = vpack.c.bf16 %v1884_v26, %v1883_v27  ;;  %v1571_v26 = vld [vmem:[#allocation2 + $0x32] sm:$0xff]  ;;  %v1600_v27 = vpack.c.bf16 %v1570_v22, %v1569_v20 }
 0x152   : > { %5402 = vmatmul.mubr.msk.bf16.gmra.mrb[16].mxu1 %vm931_vm1, %v6633_v21  ;;  %5333 = vmatprep.mubr.msk.bf16.mxu0 %vm931_vm1, %v6633_v21  ;;  %v6716_v28 = vpack.c.bf16 %v1572_v33, %v1571_v26  ;;  %v3106_v20 = vld [vmem:[#allocation2 + $0x91] sm:$0xff] }
 0x153   : > { %5405 = vmatprep.mubr.msk.bf16.mxu1 %vm931_vm1, %v6636_v31  ;;  %v3134_v22 = vpack.c.bf16 %v3107_v7, %v3106_v20  ;;  %v3109_v33 = vld [vmem:[#allocation2 + $0xb1] sm:$0xff]  ;;  %v3124_v20 = vld [vmem:[#allocation2 + $0x169] sm:$0xff] }
 0x154   : > { %v3125_v7 = vld [vmem:[#allocation2 + $0x171] sm:$0xff] }
 0x159   : > { %5334 = vmatmul.mubr.msk.bf16.gmra.mrb[40].mxu0 %vm931_vm1, %v6636_v31 }
 0x15a   : > { %5406 = vmatmul.mubr.msk.bf16.gmra.mrb[20].mxu1 %vm931_vm1, %v6647_v34  ;;  %5337 = vmatprep.mubr.msk.bf16.mxu0 %vm931_vm1, %v6647_v34 }
 0x15b   : > { %5409 = vmatprep.mubr.msk.bf16.mxu1 %vm931_vm1, %v6649_v35 }
 0x161   : > { %5338 = vmatmul.mubr.msk.bf16.gmra.mrb[44].mxu0 %vm931_vm1, %v6649_v35 }
 0x162   : > { %5410 = vmatmul.mubr.msk.bf16.gmra.mrb[24].mxu1 %vm931_vm1, %v6659_v39  ;;  %5341 = vmatprep.mubr.msk.bf16.mxu0 %vm931_vm1, %v6659_v39 }
 0x163   : > { %5413 = vmatprep.mubr.msk.bf16.mxu1 %vm931_vm1, %v6661_v42 }
 0x169   : > { %5342 = vmatmul.mubr.msk.bf16.gmra.mrb[48].mxu0 %vm931_vm1, %v6661_v42 }
 0x16a   : > { %5414 = vmatmul.mubr.msk.bf16.gmra.mrb[28].mxu1 %vm931_vm1, %v6671_v32  ;;  %5345 = vmatprep.mubr.msk.bf16.mxu0 %vm931_vm1, %v6671_v32 }
 0x16b   : > { %5417 = vmatprep.mubr.msk.bf16.mxu1 %vm931_vm1, %v6673_v29 }
 0x171   : > { %5346 = vmatmul.mubr.msk.bf16.gmra.mrb[52].mxu0 %vm931_vm1, %v6673_v29 }
 0x172   : > { %5418 = vmatmul.mubr.msk.bf16.gmra.mrb[0].mxu1 %vm931_vm1, %v6683_v57  ;;  %5349 = vmatprep.mubr.msk.bf16.mxu0 %vm931_vm1, %v6683_v57 }
 0x173   : > { %5421 = vmatprep.mubr.msk.bf16.mxu1 %vm931_vm1, %v6685_v60 }
 0x179   : > { %5350 = vmatmul.mubr.msk.bf16.gmra.mrb[56].mxu0 %vm931_vm1, %v6685_v60 }
 0x17a   : > { %5422 = vmatmul.mubr.msk.bf16.gmra.mrb[4].mxu1 %vm931_vm1, %v6695_v3  ;;  %5353 = vmatprep.mubr.msk.bf16.mxu0 %vm931_vm1, %v6695_v3 }
 0x17b   : > { %5425 = vmatprep.mubr.msk.bf16.mxu1 %vm931_vm1, %v6697_v5 }
 0x181   : > { %5354 = vmatmul.mubr.msk.bf16.gmra.mrb[60].mxu0 %vm931_vm1, %v6697_v5 }
 0x182   : > { %5426 = vmatmul.mubr.msk.bf16.gmra.mrb[8].mxu1 %vm931_vm1, %v6707_v19  ;;  %5361 = vmatprep.mubr.msk.bf16.mxu0 %vm931_vm1, %v1599_v13 }
 0x183   : > { %5433 = vmatprep.mubr.msk.bf16.mxu1 %vm931_vm1, %v6444_v8  ;;  %v1573_v8 = vld [vmem:[#allocation2 + $0x4a] sm:$0xff] }
 0x184   : > { %v6732_v44 = vpack.c.bf16 %v1574_v38, %v1573_v8  ;;  %v3108_v38 = vld [vmem:[#allocation2 + $0xa9] sm:$0xff] }
 0x189   : > { %5362 = vmatmul.mubr.msk.bf16.vlgmr.msra.gmra.mrb[32].mxu0 %vm931_vm1, %v1600_v27 }
 0x18a   : > { %5434 = vmatmul.mubr.msk.bf16.vlgmr.msra.gmra.mrb[12].mxu1 %vm931_vm1, %v6451_v14  ;;  %5365 = vmatprep.mubr.msk.bf16.mxu0 %vm931_vm1, %v6716_v28  ;;  %v6734_v14 = vpack.c.bf16 %v1576_v43, %v1575_v40  ;;  %v3135_v40 = vpack.c.bf16 %v3109_v33, %v3108_v38  ;;  %v3110_v43 = vld [vmem:[#allocation2 + $0xc1] sm:$0xff]  ;;  %v3143_v33 = vpack.c.bf16 %v3125_v7, %v3124_v20 }
 0x18b   : > { %5437 = vmatprep.mubr.msk.bf16.mxu1 %vm931_vm1, %v6468_v36  ;;  %5466 = vmatpush3.bf16.msra.mxu1 %v6631_v15  ;;  %v1577_v36 = vld [vmem:[#allocation2 + $0x7a] sm:$0xff]  ;;  %v1578_v15 = vld [vmem:[#allocation2 + $0x82] sm:$0xff] }
 0x18c   : > { %5467 = vmatprep.subr.bf16.mxu1 %v6050_v37  ;;  %v6744_v51 = vpack.c.bf16 %v1578_v15, %v1577_v36  ;;  %v3129_v38 = vld [vmem:[#allocation2 + $0x1a1] sm:$0xff] }
 0x18f   : > { %5468 = vmatpush3.bf16.msra.mxu1 %v6050_v37  ;;  %v3111_v37 = vld [vmem:[#allocation2 + $0xc9] sm:$0xff] }
 0x190   : > { %5501 = vmatprep.subr.bf16.mxu1 %v6051_v30  ;;  %v3136_v36 = vpack.c.bf16 %v3111_v37, %v3110_v43  ;;  %v3128_v37 = vld [vmem:[#allocation2 + $0x199] sm:$0xff] }
 0x191   : > { %5366 = vmatmul.mubr.msk.bf16.gmra.mrb[36].mxu0 %vm931_vm1, %v6732_v44 }
 0x192   : > { %5438 = vmatmul.mubr.msk.bf16.gmra.mrb[16].mxu1 %vm931_vm1, %v6473_v41  ;;  %5369 = vmatprep.mubr.msk.bf16.mxu0 %vm931_vm1, %v6734_v14  ;;  %v1581_v41 = vld [vmem:[#allocation2 + $0xaa] sm:$0xff] }
 0x193   : > { %5441 = vmatprep.mubr.msk.bf16.mxu1 %vm931_vm1, %v6489_v58  ;;  %v1582_v58 = vld [vmem:[#allocation2 + $0xb2] sm:$0xff] }
 0x194   : > { %v6756_v61 = vpack.c.bf16 %v1582_v58, %v1581_v41  ;;  %v3115_v41 = vld [vmem:[#allocation2 + $0xf9] sm:$0xff] }
 0x199   : > { %5370 = vmatmul.mubr.msk.bf16.gmra.mrb[40].mxu0 %vm931_vm1, %v6744_v51 }
 0x19a   : > { %5442 = vmatmul.mubr.msk.bf16.gmra.mrb[20].mxu1 %vm931_vm1, %v6493_v63  ;;  %5373 = vmatprep.mubr.msk.bf16.mxu0 %vm931_vm1, %v6746_v54  ;;  %v1585_v63 = vld [vmem:[#allocation2 + $0xda] sm:$0xff] }
 0x19b   : > { %5445 = vmatprep.mubr.msk.bf16.mxu1 %vm931_vm1, %v6509_v18  ;;  %v1586_v18 = vld [vmem:[#allocation2 + $0xe2] sm:$0xff] }
 0x19c   : > { %v6768_v0 = vpack.c.bf16 %v1586_v18, %v1585_v63  ;;  %v3137_v63 = vpack.c.bf16 %v3113_v46, %v3112_v56  ;;  %v3114_v18 = vld [vmem:[#allocation2 + $0xf1] sm:$0xff] }
 0x1a1   : > { %5374 = vmatmul.mubr.msk.bf16.gmra.mrb[44].mxu0 %vm931_vm1, %v6756_v61 }
 0x1a2   : > { %5446 = vmatmul.mubr.msk.bf16.gmra.mrb[24].mxu1 %vm931_vm1, %v6513_v23  ;;  %5377 = vmatprep.mubr.msk.bf16.mxu0 %vm931_vm1, %v6758_v62  ;;  %v2210_v23 = vld [vmem:[#allocation2 + $0x189] sm:$0xff] }
 0x1a3   : > { %5449 = vmatprep.mubr.msk.bf16.mxu1 %vm931_vm1, %v6531_v50  ;;  %v2209_v50 = vld [vmem:[#allocation2 + $0x181] sm:$0xff] }
 0x1a4   : > { %v6784_v4 = vpack.c.bf16 %v2210_v23, %v2209_v50  ;;  %v3138_v23 = vpack.c.bf16 %v3115_v41, %v3114_v18 }
 0x1a9   : > { %5378 = vmatmul.mubr.msk.bf16.gmra.mrb[48].mxu0 %vm931_vm1, %v6768_v0 }
 0x1aa   : > { %5450 = vmatmul.mubr.msk.bf16.gmra.mrb[28].mxu1 %vm931_vm1, %v6537_v55  ;;  %v6052_v55 = vld [vmem:[%s7509_s4 + $0x68] sm:$0xff]  }
 0x1ab   : > { %5453 = vmatprep.mubr.msk.bf16.mxu1 %vm931_vm1, %v6553_v16  ;;  %v6053_v16 = vld [vmem:[%s7509_s4 + $0x70] sm:$0xff]  }
 0x1b2   : > { %5454 = vmatmul.mubr.msk.bf16.gmra.mrb[0].mxu1 %vm931_vm1, %v6559_v24  ;;  %v2515_v24 = vld [vmem:[#allocation2 + $0x182] sm:$0xff] }
 0x1b3   : > { %5457 = vmatprep.mubr.msk.bf16.mxu1 %vm931_vm1, %v6586_v48  ;;  %v2516_v48 = vld [vmem:[#allocation2 + $0x18a] sm:$0xff] }
 0x1ba   : > { %5458 = vmatmul.mubr.msk.bf16.gmra.mrb[4].mxu1 %vm931_vm1, %v6590_v52  ;;  %v6823_v52 = vpack.c.bf16 %v2516_v48, %v2515_v24  ;;  %v3119_v24 = vld [vmem:[#allocation2 + $0x129] sm:$0xff] }
 0x1bb   : > { %5461 = vmatprep.mubr.msk.bf16.mxu1 %vm931_vm1, %v6602_v1  ;;  %v3099_v1 = vld [vmem:[#allocation2 + $0x39] sm:$0xff] }
 0x1c2   : > { %5462 = vmatmul.mubr.msk.bf16.gmra.mrb[8].mxu1 %vm931_vm1, %v6784_v4 }
 0x1c3   : > { %5469 = vmatprep.mubr.msk.bf16.mxu1 %vm931_vm1, %v1600_v27 }
 0x1ca   : > { %5470 = vmatmul.mubr.msk.bf16.vlgmr.msra.gmra.mrb[12].mxu1 %vm931_vm1, %v6716_v28 }
 0x1cb   : > { %5473 = vmatprep.mubr.msk.bf16.mxu1 %vm931_vm1, %v6732_v44  ;;  %5502 = vmatpush3.bf16.msra.mxu1 %v6051_v30 }
 0x1cc   : > { %5503 = vmatprep.subr.bf16.mxu1 %v6052_v55 }
 0x1cf   : > { %5504 = vmatpush3.bf16.msra.mxu1 %v6052_v55  ;;  %v3117_v55 = vld [vmem:[#allocation2 + $0x111] sm:$0xff] }
 0x1d0   : > { %5537 = vmatprep.subr.bf16.mxu1 %v6053_v16 }
 0x1d2   : > { %5474 = vmatmul.mubr.msk.bf16.gmra.mrb[16].mxu1 %vm931_vm1, %v6734_v14 }
 0x1d3   : > { %5477 = vmatprep.mubr.msk.bf16.mxu1 %vm931_vm1, %v6744_v51 }
 0x1da   : > { %5478 = vmatmul.mubr.msk.bf16.gmra.mrb[20].mxu1 %vm931_vm1, %v6746_v54 }
 0x1db   : > { %5481 = vmatprep.mubr.msk.bf16.mxu1 %vm931_vm1, %v6756_v61 }
 0x1e2   : > { %5482 = vmatmul.mubr.msk.bf16.gmra.mrb[24].mxu1 %vm931_vm1, %v6758_v62 }
 0x1e3   : > { %5485 = vmatprep.mubr.msk.bf16.mxu1 %vm931_vm1, %v6768_v0 }
 0x1ea   : > { %5486 = vmatmul.mubr.msk.bf16.gmra.mrb[28].mxu1 %vm931_vm1, %v6527_v45  ;;  %v6054_v45 = vld [vmem:[%s7509_s4 + $0x78] sm:$0xff]  }
 0x1eb   : > { %5489 = vmatprep.mubr.msk.bf16.mxu1 %vm931_vm1, %v6555_v17  ;;  %v6055_v17 = vld [vmem:[%s7509_s4 + $0x80] sm:$0xff]  }
 0x1f2   : > { %5490 = vmatmul.mubr.msk.bf16.gmra.mrb[0].mxu1 %vm931_vm1, %v6561_v25  ;;  %v2822_v25 = vld [vmem:[#allocation2 + $0x198] sm:$0xff] }
 0x1f3   : > { %5493 = vmatprep.mubr.msk.bf16.mxu1 %vm931_vm1, %v6588_v49  ;;  %v2823_v49 = vld [vmem:[#allocation2 + $0x1a0] sm:$0xff] }
 0x1fa   : > { %5494 = vmatmul.mubr.msk.bf16.gmra.mrb[4].mxu1 %vm931_vm1, %v6592_v53  ;;  %v2839_v53 = vpack.c.bf16 %v2823_v49, %v2822_v25  ;;  %v3118_v49 = vld [vmem:[#allocation2 + $0x121] sm:$0xff] }
 0x1fb   : > { %5497 = vmatprep.mubr.msk.bf16.mxu1 %vm931_vm1, %v6604_v2  ;;  %v3098_v2 = vld [vmem:[#allocation2 + $0x31] sm:$0xff] }
 0x202   : > { %5498 = vmatmul.mubr.msk.bf16.gmra.mrb[8].mxu1 %vm931_vm1, %v6823_v52 }
 0x203   : > { %5505 = vmatprep.mubr.msk.bf16.mxu1 %vm931_vm1, %v6612_v9  ;;  %v3130_v9 = vpack.c.bf16 %v3099_v1, %v3098_v2  ;;  %v3121_v2 = vld [vmem:[#allocation2 + $0x141] sm:$0xff] }
 0x20a   : > { %5506 = vmatmul.mubr.msk.bf16.vlgmr.msra.gmra.mrb[12].mxu1 %vm931_vm1, %v6614_v11 }
 0x20b   : > { %5509 = vmatprep.mubr.msk.bf16.mxu1 %vm931_vm1, %v6633_v21  ;;  %5538 = vmatpush3.bf16.msra.mxu1 %v6053_v16  ;;  %v3101_v21 = vld [vmem:[#allocation2 + $0x51] sm:$0xff] }
 0x20c   : > { %5539 = vmatprep.subr.bf16.mxu1 %v6054_v45 }
 0x20f   : > { %5540 = vmatpush3.bf16.msra.mxu1 %v6054_v45  ;;  %v3116_v45 = vld [vmem:[#allocation2 + $0x109] sm:$0xff] }
 0x210   : > { %5573 = vmatprep.subr.bf16.mxu1 %v6055_v17  ;;  %v3139_v25 = vpack.c.bf16 %v3117_v55, %v3116_v45  ;;  %v3429_v55 = vld [vmem:[#allocation2 + $0x15a] sm:$0xff] }
 0x212   : > { %5510 = vmatmul.mubr.msk.bf16.gmra.mrb[16].mxu1 %vm931_vm1, %v6636_v31 }
 0x213   : > { %5513 = vmatprep.mubr.msk.bf16.mxu1 %vm931_vm1, %v6647_v34  ;;  %v3103_v34 = vld [vmem:[#allocation2 + $0x69] sm:$0xff] }
 0x21a   : > { %5514 = vmatmul.mubr.msk.bf16.gmra.mrb[20].mxu1 %vm931_vm1, %v6649_v35 }
 0x21b   : > { %5517 = vmatprep.mubr.msk.bf16.mxu1 %vm931_vm1, %v6659_v39  ;;  %v3100_v39 = vld [vmem:[#allocation2 + $0x49] sm:$0xff] }
 0x222   : > { %5518 = vmatmul.mubr.msk.bf16.gmra.mrb[24].mxu1 %vm931_vm1, %v6661_v42 }
 0x223   : > { %5521 = vmatprep.mubr.msk.bf16.mxu1 %vm931_vm1, %v6671_v32  ;;  %v3131_v32 = vpack.c.bf16 %v3101_v21, %v3100_v39  ;;  %v3123_v21 = vld [vmem:[#allocation2 + $0x159] sm:$0xff] }
 0x224   : > { %v3120_v39 = vld [vmem:[#allocation2 + $0x139] sm:$0xff] }
 0x22a   : > { %5522 = vmatmul.mubr.msk.bf16.gmra.mrb[28].mxu1 %vm931_vm1, %v6673_v29  ;;  %v3102_v29 = vld [vmem:[#allocation2 + $0x61] sm:$0xff] }
 0x22b   : > { %5525 = vmatprep.mubr.msk.bf16.mxu1 %vm931_vm1, %v6683_v57  ;;  %v6056_v57 = vld [vmem:[%s7509_s4 + $0x88] sm:$0xff]  }
 0x232   : > { %5526 = vmatmul.mubr.msk.bf16.gmra.mrb[0].mxu1 %vm931_vm1, %v6685_v60  ;;  %v3132_v60 = vpack.c.bf16 %v3103_v34, %v3102_v29  ;;  %v3141_v29 = vpack.c.bf16 %v3121_v2, %v3120_v39  ;;  %v3435_v2 = vld [vmem:[#allocation2 + $0x1a2] sm:$0xff] }
 0x233   : > { %5529 = vmatprep.mubr.msk.bf16.mxu1 %vm931_vm1, %v6695_v3  ;;  %v6057_v39 = vld [vmem:[%s7512_s7] sm:$0xff]  }
 0x234   : > { %5609 = vmatprep.subr.bf16.mxu0 %v6057_v39 }
 0x235   : > { %5610 = vmatpush3.bf16.msra.mxu0 %v6057_v39 }
 0x23a   : > { %5530 = vmatmul.mubr.msk.bf16.gmra.mrb[4].mxu1 %vm931_vm1, %v6697_v5  ;;  %v3105_v5 = vld [vmem:[#allocation2 + $0x81] sm:$0xff] }
 0x23b   : > { %5533 = vmatprep.mubr.msk.bf16.mxu1 %vm931_vm1, %v6707_v19  ;;  %v3133_v19 = vpack.c.bf16 %v3105_v5, %v3104_v12 }
 0x242   : > { %5534 = vmatmul.mubr.msk.bf16.gmra.mrb[8].mxu1 %vm931_vm1, %v2839_v53  ;;  %v3140_v53 = vpack.c.bf16 %v3119_v24, %v3118_v49 }
 0x243   : > { %5541 = vmatprep.mubr.msk.bf16.mxu1 %vm931_vm1, %v3130_v9 }
 0x244   : > { %v6865_v11 = vpop.f32.mrb[52].mxu0 }
 0x245   : > { %v6867_v31 = vpop.f32.mrb[53].mxu0 }
 0x246   : > { %v6869_v35 = vpop.f32.mrb[54].mxu0 }
 0x247   : > { %v6871_v42 = vpop.f32.mrb[55].mxu0 }
 0x24a   : > { %5542 = vmatmul.mubr.msk.bf16.vlgmr.msra.gmra.mrb[12].mxu1 %vm931_vm1, %v3131_v32 }
 0x24b   : > { %5545 = vmatprep.mubr.msk.bf16.mxu1 %vm931_vm1, %v3132_v60  ;;  %5574 = vmatpush3.bf16.msra.mxu1 %v6055_v17 }
 0x24c   : > { %5575 = vmatprep.subr.bf16.mxu1 %v6056_v57  ;;  %v6878_v3 = vpop.f32.mrb[56].mxu0 }
 0x24d   : > { %v6880_v6 = vpop.f32.mrb[57].mxu0 }
 0x24e   : > { %v6882_v10 = vpop.f32.mrb[58].mxu0 }
 0x24f   : > { %5576 = vmatpush3.bf16.msra.mxu1 %v6056_v57  ;;  %v6884_v13 = vpop.f32.mrb[59].mxu0  ;;  %v3122_v57 = vld [vmem:[#allocation2 + $0x151] sm:$0xff] }
 0x250   : > { %v3142_v60 = vpack.c.bf16 %v3123_v21, %v3122_v57 }
 0x252   : > { %5546 = vmatmul.mubr.msk.bf16.gmra.mrb[16].mxu1 %vm931_vm1, %v3133_v19 }
 0x253   : > { %5549 = vmatprep.mubr.msk.bf16.mxu1 %vm931_vm1, %v3134_v22 }
 0x254   : > { %v6888_v26 = vpop.f32.mrb[60].mxu0 }
 0x255   : > { %v6890_v27 = vpop.f32.mrb[61].mxu0 }
 0x256   : > { %v6892_v8 = vpop.f32.mrb[62].mxu0 }
 0x257   : > { %v6894_v30 = vpop.f32.mrb[63].mxu0 }
 0x25a   : > { %5550 = vmatmul.mubr.msk.bf16.gmra.mrb[20].mxu1 %vm931_vm1, %v3135_v40 }
 0x25b   : > { %5553 = vmatprep.mubr.msk.bf16.mxu1 %vm931_vm1, %v3136_v36  ;;  %v3145_v36 = vpack.c.bf16 %v3129_v38, %v3128_v37 }
 0x25c   : > { %v6898_v15 = vpop.f32.mrb[32].mxu0 }
 0x25d   : > { %v6900_v47 = vpop.f32.mrb[33].mxu0 }
 0x25e   : > { %v6902_v58 = vpop.f32.mrb[34].mxu0 }
 0x25f   : > { %v6904_v59 = vpop.f32.mrb[35].mxu0 }
 0x262   : > { %5554 = vmatmul.mubr.msk.bf16.gmra.mrb[24].mxu1 %vm931_vm1, %v3137_v63  ;;  %v3425_v63 = vld [vmem:[#allocation2 + $0x12a] sm:$0xff] }
 0x263   : > { %5557 = vmatprep.mubr.msk.bf16.mxu1 %vm931_vm1, %v3138_v23  ;;  %v3428_v23 = vld [vmem:[#allocation2 + $0x152] sm:$0xff] }
 0x264   : > { %v6908_v50 = vpop.f32.mrb[36].mxu0  ;;  %v3448_v45 = vpack.c.bf16 %v3429_v55, %v3428_v23 }
 0x265   : > { %v6910_v16 = vpop.f32.mrb[37].mxu0 }
 0x266   : > { %v6912_v48 = vpop.f32.mrb[38].mxu0 }
 0x267   : > { %v6914_v17 = vpop.f32.mrb[39].mxu0 }
 0x26a   : > { %5558 = vmatmul.mubr.msk.bf16.gmra.mrb[28].mxu1 %vm931_vm1, %v3139_v25  ;;  %v3431_v25 = vld [vmem:[#allocation2 + $0x172] sm:$0xff] }
 0x26b   : > { %5561 = vmatprep.mubr.msk.bf16.mxu1 %vm931_vm1, %v3140_v53  ;;  %v3434_v53 = vld [vmem:[#allocation2 + $0x19a] sm:$0xff] }
 0x26c   : > { %v6918_v1 = vpop.f32.mrb[40].mxu0  ;;  %v3451_v21 = vpack.c.bf16 %v3435_v2, %v3434_v53 }
 0x26d   : > { %v6920_v9 = vpop.f32.mrb[41].mxu0 }
 0x26e   : > { %v6922_v34 = vpop.f32.mrb[42].mxu0 }
 0x26f   : > { %v6924_v32 = vpop.f32.mrb[43].mxu0 }
 0x272   : > { %5562 = vmatmul.mubr.msk.bf16.gmra.mrb[0].mxu1 %vm931_vm1, %v3141_v29  ;;  %v6058_v29 = vld [vmem:[%s7512_s7 + $0x8] sm:$0xff]  }
 0x273   : > { %5565 = vmatprep.mubr.msk.bf16.mxu1 %vm931_vm1, %v3142_v60  ;;  %5611 = vmatprep.subr.bf16.mxu0 %v6058_v29  ;;  %v6985_v60 = vld [vmem:[%s7510_s5] ss:$0 sm:$0xff] }
 0x274   : > { %v6928_v5 = vpop.f32.mrb[44].mxu0  ;;  %5612 = vmatpush3.bf16.msra.mxu0 %v6058_v29 }
 0x275   : > { %v6930_v12 = vpop.f32.mrb[45].mxu0 }
 0x276   : > { %v6932_v19 = vpop.f32.mrb[46].mxu0 }
 0x277   : > { %v6934_v22 = vpop.f32.mrb[47].mxu0 }
 0x27a   : > { %5566 = vmatmul.mubr.msk.bf16.gmra.mrb[4].mxu1 %vm931_vm1, %v3143_v33  ;;  %v6991_v33 = vld [vmem:[%s7511_s6] ss:$0 sm:$0xff] }
 0x27b   : > { %5569 = vmatprep.mubr.msk.bf16.mxu1 %vm931_vm1, %v6784_v4  ;;  %v3420_v4 = vld [vmem:[#allocation2 + $0xf2] sm:$0xff] }
 0x27c   : > { %v6939_v40 = vpop.f32.mrb[48].mxu0 }
 0x27d   : > { %v6941_v43 = vpop.f32.mrb[49].mxu0 }
 0x27e   : > { %v6943_v46 = vpop.f32.mrb[50].mxu0 }
 0x27f   : > { %v6945_v41 = vpop.f32.mrb[51].mxu0 }
 0x282   : > { %5570 = vmatmul.mubr.msk.bf16.gmra.mrb[8].mxu1 %vm931_vm1, %v3145_v36 }
 0x283   : > { %5577 = vmatprep.mubr.msk.bf16.mxu1 %vm931_vm1, %v6716_v28  ;;  %v3421_v28 = vld [vmem:[#allocation2 + $0xfa] sm:$0xff] }
 0x284   : > { %v3444_v56 = vpack.c.bf16 %v3421_v28, %v3420_v4 }
 0x28a   : > { %5578 = vmatmul.mubr.msk.bf16.vlgmr.msra.gmra.mrb[12].mxu1 %vm931_vm1, %v6732_v44  ;;  %v3422_v44 = vld [vmem:[#allocation2 + $0x10a] sm:$0xff] }
 0x28b   : > { %5581 = vmatprep.mubr.msk.bf16.mxu1 %vm931_vm1, %v6734_v14  ;;  %v3423_v14 = vld [vmem:[#allocation2 + $0x112] sm:$0xff] }
 0x28c   : > { %v3445_v18 = vpack.c.bf16 %v3423_v14, %v3422_v44 }
 0x292   : > { %5582 = vmatmul.mubr.msk.bf16.gmra.mrb[16].mxu1 %vm931_vm1, %v6744_v51  ;;  %v3424_v51 = vld [vmem:[#allocation2 + $0x122] sm:$0xff] }
 0x293   : > { %5585 = vmatprep.mubr.msk.bf16.mxu1 %vm931_vm1, %v6746_v54  ;;  %v3446_v54 = vpack.c.bf16 %v3425_v63, %v3424_v51 }
 0x29a   : > { %5586 = vmatmul.mubr.msk.bf16.gmra.mrb[20].mxu1 %vm931_vm1, %v6756_v61  ;;  %v3426_v61 = vld [vmem:[#allocation2 + $0x13a] sm:$0xff] }
 0x29b   : > { %5589 = vmatprep.mubr.msk.bf16.mxu1 %vm931_vm1, %v6758_v62  ;;  %v3427_v62 = vld [vmem:[#allocation2 + $0x142] sm:$0xff] }
 0x29c   : > { %v3447_v24 = vpack.c.bf16 %v3427_v62, %v3426_v61 }
 0x2a2   : > { %5590 = vmatmul.mubr.msk.bf16.gmra.mrb[24].mxu1 %vm931_vm1, %v6768_v0  ;;  %v3430_v0 = vld [vmem:[#allocation2 + $0x16a] sm:$0xff] }
 0x2a3   : > { %5593 = vmatprep.mubr.msk.bf16.mxu1 %vm931_vm1, %v3444_v56  ;;  %v3449_v49 = vpack.c.bf16 %v3431_v25, %v3430_v0 }
 0x2aa   : > { %5594 = vmatmul.mubr.msk.bf16.gmra.mrb[28].mxu1 %vm931_vm1, %v3445_v18 }
 0x2ab   : > { %5597 = vmatprep.mubr.msk.bf16.mxu1 %vm931_vm1, %v3446_v54 }
 0x2b2   : > { %5598 = vmatmul.mubr.msk.bf16.gmra.mrb[0].mxu1 %vm931_vm1, %v3447_v24 }
 0x2b3   : > { %5601 = vmatprep.mubr.msk.bf16.mxu1 %vm931_vm1, %v3448_v45 }
 0x2ba   : > { %5602 = vmatmul.mubr.msk.bf16.gmra.mrb[4].mxu1 %vm931_vm1, %v3449_v49 }
 0x2bb   : > { %5605 = vmatprep.mubr.msk.bf16.mxu1 %vm931_vm1, %v6823_v52  ;;  %v6059_v52 = vld [vmem:[%s7515_s10] sm:$0xff]  }
 0x2bc   : > { %5645 = vmatprep.subr.bf16.mxu0 %v6059_v52 }
 0x2c2   : > { %5606 = vmatmul.mubr.msk.bf16.gmra.mrb[8].mxu1 %vm931_vm1, %v3451_v21 }
 0x35d   : > { %v5579_v57 = vpop.f32.mrb[12].mxu1 }
 0x35e   : > { %v5721_v7 = vadd.f32 %v5579_v57, %v6898_v15  ;;  %v3551_v20 = vpop.f32.mrb[13].mxu1 }
 0x35f   : > { %v5722_v37 = vadd.f32 %v3551_v20, %v6900_v47  ;;  %v5580_v38 = vpop.f32.mrb[14].mxu1 }
 0x360   : > { %v3719_v36 = vmul.f32 %v5721_v7, %v6985_v60  ;;  %v5723_v4 = vadd.f32 %v5580_v38, %v6902_v58  ;;  %v3554_v28 = vpop.f32.mrb[15].mxu1 }
 0x361   : > { %v3717_v56 = vmul.f32 %v5722_v37, %v6985_v60  ;;  %v5724_v44 = vadd.f32 %v3554_v28, %v6904_v59  ;;  %v6061_v28 = vld [vmem:[%s7515_s10 + $0x10] sm:$0xff]  }
 0x362   : > { %v3758_v15 = vadd.f32 %v6991_v33, %v3719_v36  ;;  %v3720_v14 = vmul.f32 %v5723_v4, %v6985_v60 }
 0x363   : > { %v3756_v51 = vadd.f32 %v6991_v33, %v3717_v56  ;;  %v3718_v63 = vmul.f32 %v5724_v44, %v6985_v60 }
 0x364   : > { %v3759_v47 = vadd.f32 %v6991_v33, %v3720_v14  ;;  %v3790_v61 = vmax.f32 %v3758_v15, 0.0 }
 0x365   : > { %v3757_v18 = vadd.f32 %v6991_v33, %v3718_v63  ;;  %v5583_v54 = vpop.f32.mrb[16].mxu1  ;;  %v3788_v55 = vmax.f32 %v3756_v51, 0.0 }
 0x366   : > { %v3791_v58 = vmax.f32 %v3759_v47, 0.0  ;;  %v5725_v62 = vadd.f32 %v5583_v54, %v6908_v50  ;;  %v3567_v23 = vpop.f32.mrb[17].mxu1 }
 0x367   : > { %v3789_v59 = vmax.f32 %v3757_v18, 0.0  ;;  %v5726_v24 = vadd.f32 %v3567_v23, %v6910_v16  ;;  %v5584_v45 = vpop.f32.mrb[18].mxu1  ;;  %v6060_v16 = vld [vmem:[%s7515_s10 + $0x8] sm:$0xff]  }
 0x368   : > { %v3821_v0 = vpack.c.bf16 %v3791_v58, %v3790_v61  ;;  %v3723_v25 = vmul.f32 %v5725_v62, %v6985_v60  ;;  %v5727_v49 = vadd.f32 %v5584_v45, %v6912_v48  ;;  %v3570_v53 = vpop.f32.mrb[19].mxu1 }
 0x369   : > { %v3820_v2 = vpack.c.bf16 %v3789_v59, %v3788_v55  ;;  %v3721_v21 = vmul.f32 %v5726_v24, %v6985_v60  ;;  %v5728_v39 = vadd.f32 %v3570_v53, %v6914_v17 }
 0x36a   : > { %v3762_v29 = vadd.f32 %v6991_v33, %v3723_v25  ;;  %v3724_v50 = vmul.f32 %v5727_v49, %v6985_v60 }
 0x36b   : > { %v3760_v57 = vadd.f32 %v6991_v33, %v3721_v21  ;;  %v3722_v7 = vmul.f32 %v5728_v39, %v6985_v60  ;;  %5613 = vmatprep.mubr.msk.bf16.mxu0 %vm931_vm1, %v3820_v2 }
 0x36c   : > { %v3763_v48 = vadd.f32 %v6991_v33, %v3724_v50  ;;  %5614 = vmatmul.mubr.msk.bf16.vlgmr.msra.gmra.mrb[64].mxu0 %vm931_vm1, %v3821_v0  ;;  %v3794_v37 = vmax.f32 %v3762_v29, 0.0 }
 0x36d   : > { %v3761_v17 = vadd.f32 %v6991_v33, %v3722_v7  ;;  %v5587_v20 = vpop.f32.mrb[20].mxu1  ;;  %5646 = vmatpush3.bf16.msra.mxu0 %v6059_v52  ;;  %v3792_v56 = vmax.f32 %v3760_v57, 0.0 }
 0x36e   : > { %v3795_v38 = vmax.f32 %v3763_v48, 0.0  ;;  %v5729_v36 = vadd.f32 %v5587_v20, %v6918_v1  ;;  %v3583_v4 = vpop.f32.mrb[21].mxu1  ;;  %5647 = vmatprep.subr.bf16.mxu0 %v6060_v16 }
 0x36f   : > { %v3793_v44 = vmax.f32 %v3761_v17, 0.0  ;;  %v5730_v15 = vadd.f32 %v3583_v4, %v6920_v9  ;;  %v5588_v14 = vpop.f32.mrb[22].mxu1  ;;  %v6062_v9 = vld [vmem:[%s7515_s10 + $0x18] sm:$0xff]  }
 0x370   : > { %v3823_v51 = vpack.c.bf16 %v3795_v38, %v3794_v37  ;;  %v3727_v63 = vmul.f32 %v5729_v36, %v6985_v60  ;;  %v5731_v52 = vadd.f32 %v5588_v14, %v6922_v34  ;;  %v3586_v47 = vpop.f32.mrb[23].mxu1 }
 0x371   : > { %v3822_v18 = vpack.c.bf16 %v3793_v44, %v3792_v56  ;;  %v3725_v1 = vmul.f32 %v5730_v15, %v6985_v60  ;;  %v5732_v54 = vadd.f32 %v3586_v47, %v6924_v32  ;;  %5648 = vmatpush3.bf16.msra.mxu0 %v6060_v16 }
 0x372   : > { %v3766_v61 = vadd.f32 %v6991_v33, %v3727_v63  ;;  %v3728_v58 = vmul.f32 %v5731_v52, %v6985_v60  ;;  %5649 = vmatprep.subr.bf16.mxu0 %v6061_v28 }
 0x373   : > { %v3764_v62 = vadd.f32 %v6991_v33, %v3725_v1  ;;  %v3726_v34 = vmul.f32 %v5732_v54, %v6985_v60  ;;  %5617 = vmatprep.mubr.msk.bf16.mxu0 %vm931_vm1, %v3822_v18 }
 0x374   : > { %v3767_v23 = vadd.f32 %v6991_v33, %v3728_v58  ;;  %5618 = vmatmul.mubr.msk.bf16.gmra.mrb[68].mxu0 %vm931_vm1, %v3823_v51  ;;  %v3798_v59 = vmax.f32 %v3766_v61, 0.0 }
 0x375   : > { %v3765_v32 = vadd.f32 %v6991_v33, %v3726_v34  ;;  %v5591_v55 = vpop.f32.mrb[24].mxu1  ;;  %5650 = vmatpush3.bf16.msra.mxu0 %v6061_v28  ;;  %v3796_v25 = vmax.f32 %v3764_v62, 0.0 }
 0x376   : > { %v3799_v24 = vmax.f32 %v3767_v23, 0.0  ;;  %v5733_v45 = vadd.f32 %v5591_v55, %v6928_v5  ;;  %v3599_v0 = vpop.f32.mrb[25].mxu1  ;;  %5651 = vmatprep.subr.bf16.mxu0 %v6062_v9 }
 0x377   : > { %v3797_v49 = vmax.f32 %v3765_v32, 0.0  ;;  %v5734_v53 = vadd.f32 %v3599_v0, %v6930_v12  ;;  %v5592_v2 = vpop.f32.mrb[26].mxu1 }
 0x378   : > { %v3825_v21 = vpack.c.bf16 %v3799_v24, %v3798_v59  ;;  %v3731_v39 = vmul.f32 %v5733_v45, %v6985_v60  ;;  %v5735_v29 = vadd.f32 %v5592_v2, %v6932_v19  ;;  %v3602_v50 = vpop.f32.mrb[27].mxu1 }
 0x379   : > { %v3824_v16 = vpack.c.bf16 %v3797_v49, %v3796_v25  ;;  %v3729_v57 = vmul.f32 %v5734_v53, %v6985_v60  ;;  %v5736_v7 = vadd.f32 %v3602_v50, %v6934_v22  ;;  %5652 = vmatpush3.bf16.msra.mxu0 %v6062_v9 }
 0x37a   : > { %v3770_v5 = vadd.f32 %v6991_v33, %v3731_v39  ;;  %v3732_v48 = vmul.f32 %v5735_v29, %v6985_v60 }
 0x37b   : > { %v3768_v17 = vadd.f32 %v6991_v33, %v3729_v57  ;;  %v3730_v12 = vmul.f32 %v5736_v7, %v6985_v60  ;;  %5621 = vmatprep.mubr.msk.bf16.mxu0 %vm931_vm1, %v3824_v16 }
 0x37c   : > { %v3771_v20 = vadd.f32 %v6991_v33, %v3732_v48  ;;  %5622 = vmatmul.mubr.msk.bf16.gmra.mrb[72].mxu0 %vm931_vm1, %v3825_v21  ;;  %v3802_v38 = vmax.f32 %v3770_v5, 0.0 }
 0x37d   : > { %v3769_v19 = vadd.f32 %v6991_v33, %v3730_v12  ;;  %v5595_v37 = vpop.f32.mrb[28].mxu1  ;;  %v3800_v28 = vmax.f32 %v3768_v17, 0.0 }
 0x37e   : > { %v3803_v22 = vmax.f32 %v3771_v20, 0.0  ;;  %v5737_v36 = vadd.f32 %v5595_v37, %v6939_v40  ;;  %v3615_v4 = vpop.f32.mrb[29].mxu1 }
 0x37f   : > { %v3801_v56 = vmax.f32 %v3769_v19, 0.0  ;;  %v5738_v44 = vadd.f32 %v3615_v4, %v6941_v43  ;;  %v5596_v15 = vpop.f32.mrb[30].mxu1 }
 0x380   : > { %v3827_v14 = vpack.c.bf16 %v3803_v22, %v3802_v38  ;;  %v3735_v51 = vmul.f32 %v5737_v36, %v6985_v60  ;;  %v5739_v63 = vadd.f32 %v5596_v15, %v6943_v46  ;;  %v3618_v52 = vpop.f32.mrb[31].mxu1 }
 0x381   : > { %v3826_v47 = vpack.c.bf16 %v3801_v56, %v3800_v28  ;;  %v3733_v18 = vmul.f32 %v5738_v44, %v6985_v60  ;;  %v5740_v1 = vadd.f32 %v3618_v52, %v6945_v41 }
 0x382   : > { %v3774_v54 = vadd.f32 %v6991_v33, %v3735_v51  ;;  %v3736_v40 = vmul.f32 %v5739_v63, %v6985_v60 }
 0x383   : > { %v3772_v61 = vadd.f32 %v6991_v33, %v3733_v18  ;;  %v3734_v43 = vmul.f32 %v5740_v1, %v6985_v60  ;;  %5625 = vmatprep.mubr.msk.bf16.mxu0 %vm931_vm1, %v3826_v47 }
 0x384   : > { %v3775_v58 = vadd.f32 %v6991_v33, %v3736_v40  ;;  %5626 = vmatmul.mubr.msk.bf16.gmra.mrb[76].mxu0 %vm931_vm1, %v3827_v14  ;;  %v3806_v62 = vmax.f32 %v3774_v54, 0.0 }
 0x385   : > { %v3773_v46 = vadd.f32 %v6991_v33, %v3734_v43  ;;  %v5599_v9 = vpop.f32.mrb[0].mxu1  ;;  %v3804_v32 = vmax.f32 %v3772_v61, 0.0 }
 0x386   : > { %v3807_v34 = vmax.f32 %v3775_v58, 0.0  ;;  %v5741_v41 = vadd.f32 %v5599_v9, %v6865_v11  ;;  %v3631_v23 = vpop.f32.mrb[1].mxu1 }
 0x387   : > { %v3805_v55 = vmax.f32 %v3773_v46, 0.0  ;;  %v5742_v59 = vadd.f32 %v3631_v23, %v6867_v31  ;;  %v5600_v24 = vpop.f32.mrb[2].mxu1 }
 0x388   : > { %v3829_v45 = vpack.c.bf16 %v3807_v34, %v3806_v62  ;;  %v3739_v0 = vmul.f32 %v5741_v41, %v6985_v60  ;;  %v5743_v25 = vadd.f32 %v5600_v24, %v6869_v35  ;;  %v3634_v49 = vpop.f32.mrb[3].mxu1 }
 0x389   : > { %v3828_v53 = vpack.c.bf16 %v3805_v55, %v3804_v32  ;;  %v3737_v2 = vmul.f32 %v5742_v59, %v6985_v60  ;;  %v5744_v21 = vadd.f32 %v3634_v49, %v6871_v42  ;;  %v6067_v49 = vld [vmem:[%s6284_s26 + $0x20] sm:$0xff]  }
 0x38a   : > { %v3778_v39 = vadd.f32 %v6991_v33, %v3739_v0  ;;  %v3740_v11 = vmul.f32 %v5743_v25, %v6985_v60  ;;  %v6064_v0 = vld [vmem:[%s6284_s26 + $0x8] sm:$0xff]   ;;  %v6066_v25 = vld [vmem:[%s6284_s26 + $0x18] sm:$0xff]  }
 0x38b   : > { %v3776_v29 = vadd.f32 %v6991_v33, %v3737_v2  ;;  %v3738_v31 = vmul.f32 %v5744_v21, %v6985_v60  ;;  %5629 = vmatprep.mubr.msk.bf16.mxu0 %vm931_vm1, %v3828_v53  ;;  %v6068_v53 = vld [vmem:[%s6284_s26 + $0x28] sm:$0xff]   ;;  %v6069_v2 = vld [vmem:[%s6284_s26 + $0x30] sm:$0xff]   ;;  %v6070_v21 = vld [vmem:[%s6284_s26 + $0x38] sm:$0xff]  }
 0x38c   : > { %v3779_v50 = vadd.f32 %v6991_v33, %v3740_v11  ;;  %5630 = vmatmul.mubr.msk.bf16.gmra.mrb[80].mxu0 %vm931_vm1, %v3829_v45  ;;  %v3810_v57 = vmax.f32 %v3778_v39, 0.0  ;;  %v6071_v39 = vld [vmem:[%s6284_s26 + $0x40] sm:$0xff]   ;;  %v6072_v11 = vld [vmem:[%s6284_s26 + $0x48] sm:$0xff]  }
 0x38d   : > { %v3777_v35 = vadd.f32 %v6991_v33, %v3738_v31  ;;  %v5603_v16 = vpop.f32.mrb[4].mxu1  ;;  %v3808_v48 = vmax.f32 %v3776_v29, 0.0  ;;  %v6073_v29 = vld [vmem:[%s6284_s26 + $0x50] sm:$0xff]   ;;  %v6074_v31 = vld [vmem:[%s6284_s26 + $0x58] sm:$0xff]  }
 0x38e   : > { %v3811_v7 = vmax.f32 %v3779_v50, 0.0  ;;  %v5745_v42 = vadd.f32 %v5603_v16, %v6878_v3  ;;  %v3647_v5 = vpop.f32.mrb[5].mxu1  ;;  %v6075_v50 = vld [vmem:[%s6284_s26 + $0x60] sm:$0xff]   ;;  %v6077_v16 = vld [vmem:[%s6284_s26 + $0x70] sm:$0xff]  }
 0x38f   : > { %v3809_v17 = vmax.f32 %v3777_v35, 0.0  ;;  %v5746_v12 = vadd.f32 %v3647_v5, %v6880_v6  ;;  %v5604_v20 = vpop.f32.mrb[6].mxu1  ;;  %v6076_v35 = vld [vmem:[%s6284_s26 + $0x68] sm:$0xff]  }
 0x390   : > { %v3831_v19 = vpack.c.bf16 %v3811_v7, %v3810_v57  ;;  %v3743_v37 = vmul.f32 %v5745_v42, %v6985_v60  ;;  %v5747_v38 = vadd.f32 %v5604_v20, %v6882_v10  ;;  %v3650_v22 = vpop.f32.mrb[7].mxu1  ;;  %v6078_v57 = vld [vmem:[%s6284_s26 + $0x78] sm:$0xff]  }
 0x391   : > { %v3830_v36 = vpack.c.bf16 %v3809_v17, %v3808_v48  ;;  %v3741_v4 = vmul.f32 %v5746_v12, %v6985_v60  ;;  %v5748_v28 = vadd.f32 %v3650_v22, %v6884_v13 }
 0x392   : > { %v3782_v56 = vadd.f32 %v6991_v33, %v3743_v37  ;;  %v3744_v3 = vmul.f32 %v5747_v38, %v6985_v60  ;;  %v4475_v37 = vld [vmem:[%s7518_s13 + $0x8] sm:$0xff] }
 0x393   : > { %v3780_v44 = vadd.f32 %v6991_v33, %v3741_v4  ;;  %v3742_v6 = vmul.f32 %v5748_v28, %v6985_v60  ;;  %5633 = vmatprep.mubr.msk.bf16.mxu0 %vm931_vm1, %v3830_v36 }
 0x394   : > { %v3783_v15 = vadd.f32 %v6991_v33, %v3744_v3  ;;  %5634 = vmatmul.mubr.msk.bf16.gmra.mrb[84].mxu0 %vm931_vm1, %v3831_v19  ;;  %v3814_v51 = vmax.f32 %v3782_v56, 0.0 }
 0x395   : > { %v3781_v10 = vadd.f32 %v6991_v33, %v3742_v6  ;;  %v5607_v14 = vpop.f32.mrb[8].mxu1  ;;  %v3812_v47 = vmax.f32 %v3780_v44, 0.0 }
 0x396   : > { %v3815_v63 = vmax.f32 %v3783_v15, 0.0  ;;  %v5749_v13 = vadd.f32 %v5607_v14, %v6888_v26  ;;  %v3663_v52 = vpop.f32.mrb[9].mxu1 }
 0x397   : > { %v3813_v18 = vmax.f32 %v3781_v10, 0.0  ;;  %v5750_v1 = vadd.f32 %v3663_v52, %v6890_v27  ;;  %v5608_v54 = vpop.f32.mrb[10].mxu1 }
 0x398   : > { %v3833_v40 = vpack.c.bf16 %v3815_v63, %v3814_v51  ;;  %v3747_v61 = vmul.f32 %v5749_v13, %v6985_v60  ;;  %v5751_v43 = vadd.f32 %v5608_v54, %v6892_v8  ;;  %v3666_v58 = vpop.f32.mrb[11].mxu1 }
 0x399   : > { %v3832_v46 = vpack.c.bf16 %v3813_v18, %v3812_v47  ;;  %v3745_v9 = vmul.f32 %v5750_v1, %v6985_v60  ;;  %v5752_v62 = vadd.f32 %v3666_v58, %v6894_v30 }
 0x39a   : > { %v3786_v34 = vadd.f32 %v6991_v33, %v3747_v61  ;;  %v3748_v26 = vmul.f32 %v5751_v43, %v6985_v60 }
 0x39b   : > { %v3784_v41 = vadd.f32 %v6991_v33, %v3745_v9  ;;  %v3746_v27 = vmul.f32 %v5752_v62, %v6985_v60  ;;  %5637 = vmatprep.mubr.msk.bf16.mxu0 %vm931_vm1, %v3832_v46  ;;  %v6063_v60 = vld [vmem:[%s6284_s26] sm:$0xff]  }
 0x39c   : > { %v3787_v8 = vadd.f32 %v6991_v33, %v3748_v26  ;;  %5638 = vmatmul.mubr.msk.bf16.gmra.mrb[88].mxu0 %vm931_vm1, %v3833_v40  ;;  %v3818_v23 = vmax.f32 %v3786_v34, 0.0  ;;  %v7201_v46 = vld [vmem:[%s7513_s8] ss:$0 sm:$0xff] }
 0x39d   : > { %v3785_v30 = vadd.f32 %v6991_v33, %v3746_v27  ;;  %v3816_v55 = vmax.f32 %v3784_v41, 0.0  ;;  %v6065_v33 = vld [vmem:[%s6284_s26 + $0x10] sm:$0xff]   ;;  %v7206_v9 = vld [vmem:[%s7516_s11] ss:$0 sm:$0xff]  ;;  %s4683_s26 = sshll.u32 %s458_s22, 6 }
 0x39e   : > { %v3819_v32 = vmax.f32 %v3787_v8, 0.0  ;;  %v7212_v34 = vld [vmem:[%s7514_s9] ss:$0 sm:$0xff]  ;;  %s7443_s18 = scalar_lea.vmem [#allocation3], %s4683_s26  ;;  %s6083_s26 = sshll.u32 %s6144_s15, 4  ;;  %s6084_s26 = int_to_ptr.vmem [resolvable:$false] %s6083_s26 }
 0x39f   : > { %v3817_v59 = vmax.f32 %v3785_v30, 0.0  ;;  %v7218_v27 = vld [vmem:[%s7517_s12] ss:$0 sm:$0xff]  ;;  %s4617_s21 = sshll.u32 %s7443_s18, 4  ;;  %s6085_s20 = scalar_lea.vmem %s6084_s26, 2048  ;;  %s7459_s21 = int_to_ptr.vmem [resolvable:$true] %s4617_s21 }
 0x3a0   : > { %v3835_v24 = vpack.c.bf16 %v3819_v32, %v3818_v23  ;;  %s6079_s17 = scalar_lea.vmem %s7459_s21, 1024  ;;  %p6086_p0 = scmp.lt.s32.totalorder %s7459_s21, %s6084_s26 }
 0x3a1   : > { %v3834_v45 = vpack.c.bf16 %v3817_v59, %v3816_v55  ;;  %p6080_p11 = scmp.ne.s32.totalorder %s7459_s21, %s6079_s17  ;;  %p6087_p1 = scmp.lt.s32.totalorder %s6085_s20, %s6079_s17 }
 0x3a3   : > { %5641 = vmatprep.mubr.msk.bf16.mxu0 %vm931_vm1, %v3834_v45  ;;  %p6081_p12 = pnand %p6080_p11, %p6260_p5  ;;  %p6088_p2 = por %p6087_p1, %p6086_p0 }
 0x3a4   : > { %5642 = vmatmul.mubr.msk.bf16.gmra.mrb[92].mxu0 %vm931_vm1, %v3835_v24 }
 0x3a5   : > { %5653 = vmatprep.mubr.msk.bf16.mxu0 %vm611_vm0, %v6063_v60  ;;  %p6082_p13 = pneg %p6081_p12 }
 0x3a7   : > { %p6089_p3 = pnand %p6088_p2, %p6082_p13 }
 0x3ac   : > { %5654 = vmatmul.mubr.msk.bf16.vlgmr.msra.gmra.mrb[96].mxu0 %vm611_vm0, %v6064_v0 }
 0x3ad   : > { %5657 = vmatprep.mubr.msk.bf16.mxu0 %vm611_vm0, %v6065_v33 }
 0x3b4   : > { %5658 = vmatmul.mubr.msk.bf16.gmra.mrb[100].mxu0 %vm611_vm0, %v6066_v25 }
 0x3b5   : > { %5661 = vmatprep.mubr.msk.bf16.mxu0 %vm611_vm0, %v6067_v49 }
 0x3bc   : > { %5662 = vmatmul.mubr.msk.bf16.gmra.mrb[104].mxu0 %vm611_vm0, %v6068_v53 }
 0x3bd   : > { %5665 = vmatprep.mubr.msk.bf16.mxu0 %vm611_vm0, %v6069_v2 }
 0x3c4   : > { %5666 = vmatmul.mubr.msk.bf16.gmra.mrb[108].mxu0 %vm611_vm0, %v6070_v21 }
 0x3c5   : > { %5669 = vmatprep.mubr.msk.bf16.mxu0 %vm611_vm0, %v6071_v39 }
 0x3cc   : > { %5670 = vmatmul.mubr.msk.bf16.gmra.mrb[112].mxu0 %vm611_vm0, %v6072_v11 }
 0x3cd   : > { %5673 = vmatprep.mubr.msk.bf16.mxu0 %vm611_vm0, %v6073_v29 }
 0x3d4   : > { %5674 = vmatmul.mubr.msk.bf16.gmra.mrb[116].mxu0 %vm611_vm0, %v6074_v31 }
 0x3d5   : > { %5677 = vmatprep.mubr.msk.bf16.mxu0 %vm611_vm0, %v6075_v50 }
 0x3dc   : > { %5678 = vmatmul.mubr.msk.bf16.gmra.mrb[120].mxu0 %vm611_vm0, %v6076_v35 }
 0x3dd   : > { %5681 = vmatprep.mubr.msk.bf16.mxu0 %vm611_vm0, %v6077_v16 }
 0x3e4   : > { %5682 = vmatmul.mubr.msk.bf16.gmra.mrb[124].mxu0 %vm611_vm0, %v6078_v57 }
 0x3e5   : > { %4554 = vmatprep.mubr.f32.mxu0 %v4475_v37 }
 0x43f   : > { %v5615_v7 = vpop.f32.mrb[64].mxu0 }
 0x440   : > { %v3934_v42 = vpop.f32.mrb[65].mxu0  ;;  %v4070_v62 = vmul.f32 %v5615_v7, %v7201_v46 }
 0x441   : > { %v5616_v5 = vpop.f32.mrb[66].mxu0  ;;  %v4068_v26 = vmul.f32 %v7201_v46, %v3934_v42 }
 0x442   : > { %v3937_v48 = vpop.f32.mrb[67].mxu0  ;;  %v4071_v8 = vmul.f32 %v5616_v5, %v7201_v46  ;;  %v4109_v24 = vadd.f32 %v7212_v34, %v4070_v62 }
 0x443   : > { %v4069_v32 = vmul.f32 %v7201_v46, %v3937_v48  ;;  %v4107_v33 = vadd.f32 %v7212_v34, %v4068_v26 }
 0x444   : > { %v4110_v53 = vadd.f32 %v7212_v34, %v4071_v8 }
 0x445   : > { %v4108_v39 = vadd.f32 %v7212_v34, %v4069_v32 }
 0x447   : > { %v5619_v17 = vpop.f32.mrb[68].mxu0 }
 0x448   : > { %v3950_v12 = vpop.f32.mrb[69].mxu0  ;;  %v4074_v31 = vmul.f32 %v5619_v17, %v7201_v46 }
 0x449   : > { %v5620_v20 = vpop.f32.mrb[70].mxu0  ;;  %v4072_v35 = vmul.f32 %v7201_v46, %v3950_v12 }
 0x44a   : > { %v7145_v19 = vpop.f32.mrb[71].mxu0  ;;  %v4075_v7 = vmul.f32 %v5620_v20, %v7201_v46 }
 0x44b   : > { %v4073_v62 = vmul.f32 %v7201_v46, %v7145_v19 }
 0x44f   : > { %v7150_v38 = vpop.f32.mrb[72].mxu0 }
 0x450   : > { %v7152_v22 = vpop.f32.mrb[73].mxu0 }
 0x451   : > { %v7154_v36 = vpop.f32.mrb[74].mxu0 }
 0x452   : > { %v7156_v4 = vpop.f32.mrb[75].mxu0 }
 0x457   : > { %v7158_v28 = vpop.f32.mrb[76].mxu0 }
 0x458   : > { %v7160_v56 = vpop.f32.mrb[77].mxu0 }
 0x459   : > { %v7162_v3 = vpop.f32.mrb[78].mxu0 }
 0x45a   : > { %v7164_v44 = vpop.f32.mrb[79].mxu0 }
 0x45f   : > { %v7166_v6 = vpop.f32.mrb[80].mxu0 }
 0x460   : > { %v7168_v15 = vpop.f32.mrb[81].mxu0 }
 0x461   : > { %v7170_v10 = vpop.f32.mrb[82].mxu0 }
 0x462   : > { %v7172_v14 = vpop.f32.mrb[83].mxu0 }
 0x467   : > { %v7174_v51 = vpop.f32.mrb[84].mxu0 }
 0x468   : > { %v7176_v63 = vpop.f32.mrb[85].mxu0 }
 0x469   : > { %v7178_v13 = vpop.f32.mrb[86].mxu0 }
 0x46a   : > { %v7180_v52 = vpop.f32.mrb[87].mxu0 }
 0x46f   : > { %v7182_v47 = vpop.f32.mrb[88].mxu0 }
 0x470   : > { %v7184_v18 = vpop.f32.mrb[89].mxu0 }
 0x471   : > { %v7186_v1 = vpop.f32.mrb[90].mxu0 }
 0x472   : > { %v7188_v54 = vpop.f32.mrb[91].mxu0 }
 0x477   : > { %v7190_v40 = vpop.f32.mrb[92].mxu0 }
 0x478   : > { %v7192_v61 = vpop.f32.mrb[93].mxu0 }
 0x479   : > { %v7194_v43 = vpop.f32.mrb[94].mxu0 }
 0x47a   : > { %v7196_v58 = vpop.f32.mrb[95].mxu0 }
 0x47f   : > { %v5655_v41 = vpop.f32.mrb[96].mxu0 }
 0x480   : > { %v4341_v30 = vmul.f32 %v5655_v41, %v7206_v9  ;;  %v4205_v23 = vpop.f32.mrb[97].mxu0 }
 0x481   : > { %v4339_v55 = vmul.f32 %v7206_v9, %v4205_v23  ;;  %v5656_v59 = vpop.f32.mrb[98].mxu0 }
 0x482   : > { %v4380_v45 = vadd.f32 %v7218_v27, %v4341_v30  ;;  %v4342_v60 = vmul.f32 %v5656_v59, %v7206_v9  ;;  %v4208_v0 = vpop.f32.mrb[99].mxu0  ;;  %v4113_v30 = vadd.f32 %v7212_v34, %v4074_v31 }
 0x483   : > { %v4378_v25 = vadd.f32 %v7218_v27, %v4339_v55  ;;  %v4340_v49 = vmul.f32 %v7206_v9, %v4208_v0  ;;  %v4111_v55 = vadd.f32 %v7212_v34, %v4072_v35 }
 0x484   : > { %v4412_v2 = vadd.f32 %v4380_v45, %v4109_v24  ;;  %v4381_v21 = vadd.f32 %v7218_v27, %v4342_v60  ;;  %v4114_v45 = vadd.f32 %v7212_v34, %v4075_v7 }
 0x485   : > { %v4410_v11 = vadd.f32 %v4378_v25, %v4107_v33  ;;  %v4379_v29 = vadd.f32 %v7218_v27, %v4340_v49  ;;  %v4112_v33 = vadd.f32 %v7212_v34, %v4073_v62 }
 0x486   : > { %v4413_v50 = vadd.f32 %v4381_v21, %v4110_v53  ;;  %v4444_v42 = vmax.f32 %v4412_v2, 0.0  ;;  %v4078_v53 = vmul.f32 %v7150_v38, %v7201_v46  ;;  %v4076_v21 = vmul.f32 %v7201_v46, %v7152_v22 }
 0x487   : > { %v4411_v16 = vadd.f32 %v4379_v29, %v4108_v39  ;;  %v5659_v57 = vpop.f32.mrb[100].mxu0  ;;  %v4442_v26 = vmax.f32 %v4410_v11, 0.0  ;;  %v4079_v29 = vmul.f32 %v7154_v36, %v7201_v46 }
 0x488   : > { %v4445_v5 = vmax.f32 %v4413_v50, 0.0  ;;  %v4345_v48 = vmul.f32 %v5659_v57, %v7206_v9  ;;  %v4221_v37 = vpop.f32.mrb[101].mxu0  ;;  %v4077_v57 = vmul.f32 %v7201_v46, %v7156_v4  ;;  %v4117_v22 = vadd.f32 %v7212_v34, %v4078_v53 }
 0x489   : > { %v4443_v41 = vmax.f32 %v4411_v16, 0.0  ;;  %v4343_v8 = vmul.f32 %v7206_v9, %v4221_v37  ;;  %v5660_v17 = vpop.f32.mrb[102].mxu0 }
 0x48a   : > { %v7242_v12 = vpack.c.bf16 %v4445_v5, %v4444_v42  ;;  %v4384_v23 = vadd.f32 %v7218_v27, %v4345_v48  ;;  %v4346_v20 = vmul.f32 %v5660_v17, %v7206_v9  ;;  %v4224_v32 = vpop.f32.mrb[103].mxu0  ;;  %v4118_v17 = vadd.f32 %v7212_v34, %v4079_v29 }
 0x48b   : > { %v7247_v59 = vpack.c.bf16 %v4443_v41, %v4442_v26  ;;  %v4382_v19 = vadd.f32 %v7218_v27, %v4343_v8  ;;  %v4344_v24 = vmul.f32 %v7206_v9, %v4224_v32  ;;  %v4115_v26 = vadd.f32 %v7212_v34, %v4076_v21 }
 0x48c   : > { %v4416_v60 = vadd.f32 %v4384_v23, %v4113_v30  ;;  %v4385_v0 = vadd.f32 %v7218_v27, %v4346_v20  ;;  %v4116_v20 = vadd.f32 %v7212_v34, %v4077_v57  ;;  %v4081_v21 = vmul.f32 %v7201_v46, %v7164_v44 }
 0x48d   : > { %v4414_v25 = vadd.f32 %v4382_v19, %v4111_v55  ;;  %v4383_v49 = vadd.f32 %v7218_v27, %v4344_v24  ;;  %v4082_v19 = vmul.f32 %v7158_v28, %v7201_v46 }
 0x48e   : > { %v4417_v2 = vadd.f32 %v4385_v0, %v4114_v45  ;;  %v4448_v31 = vmax.f32 %v4416_v60, 0.0  ;;  %v4080_v45 = vmul.f32 %v7201_v46, %v7160_v56 }
 0x48f   : > { %v4415_v39 = vadd.f32 %v4383_v49, %v4112_v33  ;;  %v5663_v11 = vpop.f32.mrb[104].mxu0  ;;  %v4446_v7 = vmax.f32 %v4414_v25, 0.0  ;;  %v4083_v33 = vmul.f32 %v7162_v3, %v7201_v46  ;;  %v4121_v56 = vadd.f32 %v7212_v34, %v4082_v19 }
 0x490   : > { %v4449_v50 = vmax.f32 %v4417_v2, 0.0  ;;  %v4349_v35 = vmul.f32 %v5663_v11, %v7206_v9  ;;  %v4237_v16 = vpop.f32.mrb[105].mxu0  ;;  %v4085_v19 = vmul.f32 %v7201_v46, %v7172_v14 }
 0x491   : > { %v4447_v42 = vmax.f32 %v4415_v39, 0.0  ;;  %v4347_v38 = vmul.f32 %v7206_v9, %v4237_v16  ;;  %v5664_v5 = vpop.f32.mrb[106].mxu0  ;;  %v4119_v16 = vadd.f32 %v7212_v34, %v4080_v45 }
 0x492   : > { %v7266_v48 = vpack.c.bf16 %v4449_v50, %v4448_v31  ;;  %v4388_v37 = vadd.f32 %v7218_v27, %v4349_v35  ;;  %v4350_v36 = vmul.f32 %v5664_v5, %v7206_v9  ;;  %v4240_v62 = vpop.f32.mrb[107].mxu0 }
 0x493   : > { %v7271_v41 = vpack.c.bf16 %v4447_v42, %v4446_v7  ;;  %v4386_v4 = vadd.f32 %v7218_v27, %v4347_v38  ;;  %v4348_v8 = vmul.f32 %v7206_v9, %v4240_v62  ;;  %v4122_v42 = vadd.f32 %v7212_v34, %v4083_v33 }
 0x494   : > { %v4420_v30 = vadd.f32 %v4388_v37, %v4117_v22  ;;  %v4389_v23 = vadd.f32 %v7218_v27, %v4350_v36  ;;  %v4120_v22 = vadd.f32 %v7212_v34, %v4081_v21  ;;  %v4086_v62 = vmul.f32 %v7166_v6, %v7201_v46 }
 0x495   : > { %v4418_v32 = vadd.f32 %v4386_v4, %v4115_v26  ;;  %v4387_v55 = vadd.f32 %v7218_v27, %v4348_v8  ;;  %v4084_v4 = vmul.f32 %v7201_v46, %v7168_v15 }
 0x496   : > { %v4421_v24 = vadd.f32 %v4389_v23, %v4118_v17  ;;  %v4452_v25 = vmax.f32 %v4420_v30, 0.0  ;;  %v4087_v30 = vmul.f32 %v7170_v10, %v7201_v46  ;;  %v4125_v15 = vadd.f32 %v7212_v34, %v4086_v62 }
 0x497   : > { %v4419_v60 = vadd.f32 %v4387_v55, %v4116_v20  ;;  %v5667_v0 = vpop.f32.mrb[108].mxu0  ;;  %v4450_v39 = vmax.f32 %v4418_v32, 0.0 }
 0x498   : > { %v4453_v49 = vmax.f32 %v4421_v24, 0.0  ;;  %v4353_v53 = vmul.f32 %v5667_v0, %v7206_v9  ;;  %v4253_v2 = vpop.f32.mrb[109].mxu0  ;;  %v4126_v21 = vadd.f32 %v7212_v34, %v4087_v30 }
 0x499   : > { %v4451_v11 = vmax.f32 %v4419_v60, 0.0  ;;  %v4351_v28 = vmul.f32 %v7206_v9, %v4253_v2  ;;  %v5668_v29 = vpop.f32.mrb[110].mxu0 }
 0x49a   : > { %v7290_v31 = vpack.c.bf16 %v4453_v49, %v4452_v25  ;;  %v4392_v50 = vadd.f32 %v7218_v27, %v4353_v53  ;;  %v4354_v3 = vmul.f32 %v5668_v29, %v7206_v9  ;;  %v4256_v35 = vpop.f32.mrb[111].mxu0  ;;  %v4123_v49 = vadd.f32 %v7212_v34, %v4084_v4 }
 0x49b   : > { %v7295_v57 = vpack.c.bf16 %v4451_v11, %v4450_v39  ;;  %v4390_v44 = vadd.f32 %v7218_v27, %v4351_v28  ;;  %v4352_v7 = vmul.f32 %v7206_v9, %v4256_v35  ;;  %v4124_v28 = vadd.f32 %v7212_v34, %v4085_v19 }
 0x49c   : > { %v4424_v38 = vadd.f32 %v4392_v50, %v4121_v56  ;;  %v4393_v5 = vadd.f32 %v7218_v27, %v4354_v3  ;;  %v4090_v50 = vmul.f32 %v7174_v51, %v7201_v46  ;;  %v4088_v35 = vmul.f32 %v7201_v46, %v7176_v63 }
 0x49d   : > { %v4422_v37 = vadd.f32 %v4390_v44, %v4119_v16  ;;  %v4391_v36 = vadd.f32 %v7218_v27, %v4352_v7  ;;  %v4091_v7 = vmul.f32 %v7178_v13, %v7201_v46 }
 0x49e   : > { %v4425_v26 = vadd.f32 %v4393_v5, %v4122_v42  ;;  %v4456_v23 = vmax.f32 %v4424_v38, 0.0  ;;  %v4129_v63 = vadd.f32 %v7212_v34, %v4090_v50  ;;  %v4127_v30 = vadd.f32 %v7212_v34, %v4088_v35 }
 0x49f   : > { %v4423_v8 = vadd.f32 %v4391_v36, %v4120_v22  ;;  %v5671_v17 = vpop.f32.mrb[112].mxu0  ;;  %v4454_v24 = vmax.f32 %v4422_v37, 0.0  ;;  %v4089_v37 = vmul.f32 %v7201_v46, %v7180_v52 }
 0x4a0   : > { %v4457_v20 = vmax.f32 %v4425_v26, 0.0  ;;  %v4357_v32 = vmul.f32 %v5671_v17, %v7206_v9  ;;  %v4269_v55 = vpop.f32.mrb[113].mxu0 }
 0x4a1   : > { %v4455_v45 = vmax.f32 %v4423_v8, 0.0  ;;  %v4355_v6 = vmul.f32 %v7206_v9, %v4269_v55  ;;  %v5672_v60 = vpop.f32.mrb[114].mxu0 }
 0x4a2   : > { %v7314_v0 = vpack.c.bf16 %v4457_v20, %v4456_v23  ;;  %v4396_v33 = vadd.f32 %v7218_v27, %v4357_v32  ;;  %v4358_v10 = vmul.f32 %v5672_v60, %v7206_v9  ;;  %v4272_v25 = vpop.f32.mrb[115].mxu0  ;;  %v4130_v32 = vadd.f32 %v7212_v34, %v4091_v7 }
 0x4a3   : > { %v7319_v53 = vpack.c.bf16 %v4455_v45, %v4454_v24  ;;  %v4394_v14 = vadd.f32 %v7218_v27, %v4355_v6  ;;  %v4356_v2 = vmul.f32 %v7206_v9, %v4272_v25  ;;  %v4128_v24 = vadd.f32 %v7212_v34, %v4089_v37 }
 0x4a4   : > { %v4428_v39 = vadd.f32 %v4396_v33, %v4125_v15  ;;  %v4397_v11 = vadd.f32 %v7218_v27, %v4358_v10  ;;  %v4094_v60 = vmul.f32 %v7182_v47, %v7201_v46  ;;  %v4092_v33 = vmul.f32 %v7201_v46, %v7184_v18 }
 0x4a5   : > { %v4426_v29 = vadd.f32 %v4394_v14, %v4123_v49  ;;  %v4395_v56 = vadd.f32 %v7218_v27, %v4356_v2  ;;  %v4095_v49 = vmul.f32 %v7186_v1, %v7201_v46  ;;  %v4093_v47 = vmul.f32 %v7201_v46, %v7188_v54 }
 0x4a6   : > { %v4429_v3 = vadd.f32 %v4397_v11, %v4126_v21  ;;  %v4460_v42 = vmax.f32 %v4428_v39, 0.0  ;;  %v4133_v18 = vadd.f32 %v7212_v34, %v4094_v60  ;;  %v4131_v35 = vadd.f32 %v7212_v34, %v4092_v33 }
 0x4a7   : > { %v4427_v16 = vadd.f32 %v4395_v56, %v4124_v28  ;;  %v5675_v44 = vpop.f32.mrb[116].mxu0  ;;  %v4458_v36 = vmax.f32 %v4426_v29, 0.0  ;;  %v4134_v7 = vadd.f32 %v7212_v34, %v4095_v49 }
 0x4a8   : > { %v4461_v38 = vmax.f32 %v4429_v3, 0.0  ;;  %v4361_v5 = vmul.f32 %v5675_v44, %v7206_v9  ;;  %v4285_v22 = vpop.f32.mrb[117].mxu0 }
 0x4a9   : > { %v4459_v62 = vmax.f32 %v4427_v16, 0.0  ;;  %v4359_v51 = vmul.f32 %v7206_v9, %v4285_v22  ;;  %v5676_v26 = vpop.f32.mrb[118].mxu0 }
 0x4aa   : > { %v4400_v4 = vadd.f32 %v7218_v27, %v4361_v5  ;;  %v4362_v8 = vmul.f32 %v5676_v26, %v7206_v9  ;;  %v4288_v13 = vpop.f32.mrb[119].mxu0  ;;  %v5689_v17 = vpack.c.bf16 %v4461_v38, %v4460_v42  ;;  %v4132_v5 = vadd.f32 %v7212_v34, %v4093_v47  ;;  %v4480_v47 = vld [vmem:[%s7518_s13 + $0x30] sm:$0xff] }
 0x4ab   : > { %v4398_v23 = vadd.f32 %v7218_v27, %v4359_v51  ;;  %v4360_v20 = vmul.f32 %v7206_v9, %v4288_v13  ;;  %v5685_v52 = vpack.c.bf16 %v4459_v62, %v4458_v36  ;;  %v4096_v62 = vmul.f32 %v7201_v46, %v7192_v61 }
 0x4ac   : > { %v4432_v55 = vadd.f32 %v4400_v4, %v4129_v63  ;;  %v4401_v19 = vadd.f32 %v7218_v27, %v4362_v8  ;;  %v4099_v63 = vmul.f32 %v7194_v43, %v7201_v46 }
 0x4ad   : > { %v4430_v45 = vadd.f32 %v4398_v23, %v4127_v30  ;;  %v4399_v6 = vadd.f32 %v7218_v27, %v4360_v20  ;;  %5686 = vmatprep.subr.bf16.mxu0 %v5685_v52 }
 0x4ae   : > { %v4433_v15 = vadd.f32 %v4401_v19, %v4130_v32  ;;  %5688 = vmatpush3.bf16.msra.mxu0 %v7247_v59  ;;  %v4464_v14 = vmax.f32 %v4432_v55, 0.0  ;;  %v4135_v19 = vadd.f32 %v7212_v34, %v4096_v62 }
 0x4af   : > { %v4431_v10 = vadd.f32 %v4399_v6, %v4128_v24  ;;  %v5679_v25 = vpop.f32.mrb[120].mxu0  ;;  %5690 = vmatprep.subr.bf16.mxu0 %v5689_v17  ;;  %v4462_v11 = vmax.f32 %v4430_v45, 0.0  ;;  %v4138_v45 = vadd.f32 %v7212_v34, %v4099_v63 }
 0x4b0   : > { %v4465_v2 = vmax.f32 %v4433_v15, 0.0  ;;  %v4365_v21 = vmul.f32 %v5679_v25, %v7206_v9  ;;  %v4301_v39 = vpop.f32.mrb[121].mxu0 }
 0x4b1   : > { %v4463_v28 = vmax.f32 %v4431_v10, 0.0  ;;  %v4363_v59 = vmul.f32 %v7206_v9, %v4301_v39  ;;  %v5680_v29 = vpop.f32.mrb[122].mxu0 }
 0x4b2   : > { %v4404_v56 = vadd.f32 %v7218_v27, %v4365_v21  ;;  %v4366_v50 = vmul.f32 %v5680_v29, %v7206_v9  ;;  %v4304_v1 = vpop.f32.mrb[123].mxu0  ;;  %5692 = vmatpush3.bf16.msra.mxu0 %v7242_v12  ;;  %v5697_v3 = vpack.c.bf16 %v4465_v2, %v4464_v14  ;;  %v4098_v12 = vmul.f32 %v7190_v40, %v7201_v46  ;;  %v4484_v29 = vld [vmem:[%s7518_s13 + $0x50] sm:$0xff] }
 0x4b3   : > { %v4402_v16 = vadd.f32 %v7218_v27, %v4363_v59  ;;  %v4364_v54 = vmul.f32 %v7206_v9, %v4304_v1  ;;  %v5693_v44 = vpack.c.bf16 %v4463_v28, %v4462_v11  ;;  %v4097_v40 = vmul.f32 %v7201_v46, %v7196_v58  ;;  %v4483_v11 = vld [vmem:[%s7518_s13 + $0x48] sm:$0xff]  ;;  %v4482_v28 = vld [vmem:[%s7518_s13 + $0x40] sm:$0xff]  ;;  %v4485_v59 = vld [vmem:[%s7518_s13 + $0x58] sm:$0xff] }
 0x4b4   : > { %v4436_v42 = vadd.f32 %v4404_v56, %v4133_v18  ;;  %v4405_v38 = vadd.f32 %v7218_v27, %v4366_v50  ;;  %v4137_v61 = vadd.f32 %v7212_v34, %v4098_v12  ;;  %v4487_v18 = vld [vmem:[%s7518_s13 + $0x68] sm:$0xff]  ;;  %v4486_v56 = vld [vmem:[%s7518_s13 + $0x60] sm:$0xff]  ;;  %v4489_v50 = vld [vmem:[%s7518_s13 + $0x78] sm:$0xff] }
 0x4b5   : > { %v4434_v22 = vadd.f32 %v4402_v16, %v4131_v35  ;;  %v4403_v37 = vadd.f32 %v7218_v27, %v4364_v54  ;;  %5694 = vmatprep.subr.bf16.mxu0 %v5693_v44  ;;  %v4136_v15 = vadd.f32 %v7212_v34, %v4097_v40  ;;  %v4474_v34 = vld [vmem:[%s7518_s13] sm:$0xff]  ;;  %v4488_v1 = vld [vmem:[%s7518_s13 + $0x70] sm:$0xff] }
 0x4b6   : > { %v4437_v36 = vadd.f32 %v4405_v38, %v4134_v7  ;;  %5696 = vmatpush3.bf16.msra.mxu0 %v7271_v41  ;;  %v4468_v4 = vmax.f32 %v4436_v42, 0.0 }
 0x4b7   : > { %v4435_v51 = vadd.f32 %v4403_v37, %v4132_v5  ;;  %v5683_v26 = vpop.f32.mrb[124].mxu0  ;;  %5698 = vmatprep.subr.bf16.mxu0 %v5697_v3  ;;  %v4466_v30 = vmax.f32 %v4434_v22, 0.0 }
 0x4b8   : > { %v4469_v8 = vmax.f32 %v4437_v36, 0.0  ;;  %v4369_v13 = vmul.f32 %v5683_v26, %v7206_v9  ;;  %v4317_v17 = vpop.f32.mrb[125].mxu0 }
 0x4b9   : > { %v4467_v23 = vmax.f32 %v4435_v51, 0.0  ;;  %v4367_v41 = vmul.f32 %v7206_v9, %v4317_v17  ;;  %v5684_v20 = vpop.f32.mrb[126].mxu0 }
 0x4ba   : > { %v4408_v52 = vadd.f32 %v7218_v27, %v4369_v13  ;;  %v4370_v32 = vmul.f32 %v5684_v20, %v7206_v9  ;;  %v4320_v43 = vpop.f32.mrb[127].mxu0  ;;  %5700 = vmatpush3.bf16.msra.mxu0 %v7266_v48  ;;  %v5705_v55 = vpack.c.bf16 %v4469_v8, %v4468_v4 }
 0x4bb   : > { %v4406_v24 = vadd.f32 %v7218_v27, %v4367_v41  ;;  %v4368_v58 = vmul.f32 %v7206_v9, %v4320_v43  ;;  %v5701_v46 = vpack.c.bf16 %v4467_v23, %v4466_v30 }
 0x4bc   : > { %v4440_v6 = vadd.f32 %v4408_v52, %v4137_v61  ;;  %v4409_v60 = vadd.f32 %v7218_v27, %v4370_v32 }
 0x4bd   : > { %v4438_v33 = vadd.f32 %v4406_v24, %v4135_v19  ;;  %v4407_v10 = vadd.f32 %v7218_v27, %v4368_v58  ;;  %5702 = vmatprep.subr.bf16.mxu0 %v5701_v46  ;;  %v4477_v27 = vld [vmem:[%s7518_s13 + $0x18] sm:$0xff] }
 0x4be   : > { %v4441_v48 = vadd.f32 %v4409_v60, %v4138_v45  ;;  %5704 = vmatpush3.bf16.msra.mxu0 %v7295_v57  ;;  %v4472_v49 = vmax.f32 %v4440_v6, 0.0  ;;  %v4479_v57 = vld [vmem:[%s7518_s13 + $0x28] sm:$0xff] }
 0x4bf   : > { %v4439_v25 = vadd.f32 %v4407_v10, %v4136_v15  ;;  %5706 = vmatprep.subr.bf16.mxu0 %v5705_v55  ;;  %v4470_v9 = vmax.f32 %v4438_v33, 0.0 }
 0x4c0   : > { %v4473_v14 = vmax.f32 %v4441_v48, 0.0 }
 0x4c1   : > { %v4471_v2 = vmax.f32 %v4439_v25, 0.0 }
 0x4c2   : > { %5708 = vmatpush3.bf16.msra.mxu0 %v7290_v31  ;;  %v5713_v21 = vpack.c.bf16 %v4473_v14, %v4472_v49  ;;  %v4476_v31 = vld [vmem:[%s7518_s13 + $0x10] sm:$0xff] }
 0x4c3   : > { %v5709_v39 = vpack.c.bf16 %v4471_v2, %v4470_v9 }
 0x4c5   : > { %5710 = vmatprep.subr.bf16.mxu0 %v5709_v39 }
 0x4c6   : > { %5712 = vmatpush3.bf16.msra.mxu0 %v7319_v53  ;;  %v4481_v53 = vld [vmem:[%s7518_s13 + $0x38] sm:$0xff] }
 0x4c7   : > { %5714 = vmatprep.subr.bf16.mxu0 %v5713_v21 }
 0x4ca   : > { %5716 = vmatpush3.bf16.msra.mxu0 %v7314_v0  ;;  %v4478_v0 = vld [vmem:[%s7518_s13 + $0x20] sm:$0xff] }
 0x4cd   : > { %4555 = vmatmul.mubr.f32.vlgmr.msra.gmra.mrb[128].mxu0 %v4474_v34 }
 0x4ce   : > { %4559 = vmatprep.mubr.f32.mxu0 %v4477_v27 }
 0x4d1   : > { %4560 = vmatmul.mubr.f32.gmra.mrb[130].mxu0 %v4476_v31 }
 0x4d2   : > { %4564 = vmatprep.mubr.f32.mxu0 %v4479_v57 }
 0x4d5   : > { %4565 = vmatmul.mubr.f32.gmra.mrb[132].mxu0 %v4478_v0 }
 0x4d6   : > { %4569 = vmatprep.mubr.f32.mxu0 %v4481_v53 }
 0x4d9   : > { %4570 = vmatmul.mubr.f32.gmra.mrb[134].mxu0 %v4480_v47 }
 0x4da   : > { %4574 = vmatprep.mubr.f32.mxu0 %v4483_v11 }
 0x4dd   : > { %4575 = vmatmul.mubr.f32.gmra.mrb[136].mxu0 %v4482_v28 }
 0x4de   : > { %4579 = vmatprep.mubr.f32.mxu0 %v4485_v59 }
 0x4e1   : > { %4580 = vmatmul.mubr.f32.gmra.mrb[138].mxu0 %v4484_v29 }
 0x4e2   : > { %4584 = vmatprep.mubr.f32.mxu0 %v4487_v18 }
 0x4e5   : > { %4585 = vmatmul.mubr.f32.gmra.mrb[140].mxu0 %v4486_v56 }
 0x4e6   : > { %4589 = vmatprep.mubr.f32.mxu0 %v4489_v50 }
 0x4e9   : > { %4590 = vmatmul.mubr.f32.gmra.mrb[142].mxu0 %v4488_v1 }
 0x5a0   : > { %v5221_v3 = vpop.f32.mrb[128].mxu0 }
 0x5a1   : > { %v5222_v35 = vpop.f32.mrb[129].mxu0 }
 0x5a2   : > { %v5223_v16 = vadd.f32 %v5222_v35, %v5221_v3 }
 0x5a4   : > { %4595 = vst [vmem:[%s7443_s18] sm:$0xff] %v5223_v16  ;;  %v5224_v54 = vpop.f32.mrb[130].mxu0 }
 0x5a5   : > { %v5225_v44 = vpop.f32.mrb[131].mxu0 }
 0x5a6   : > { %v5226_v7 = vadd.f32 %v5225_v44, %v5224_v54 }
 0x5a8   : > { %4596 = vst [vmem:[%s7443_s18 + $0x8] sm:$0xff] %v5226_v7  ;;  %v5227_v42 = vpop.f32.mrb[132].mxu0 }
 0x5a9   : > { %v5228_v38 = vpop.f32.mrb[133].mxu0 }
 0x5aa   : > { %v5229_v5 = vadd.f32 %v5228_v38, %v5227_v42 }
 0x5ac   : > { %4597 = vst [vmem:[%s7443_s18 + $0x10] sm:$0xff] %v5229_v5  ;;  %v5230_v22 = vpop.f32.mrb[134].mxu0 }
 0x5ad   : > { %v5231_v37 = vpop.f32.mrb[135].mxu0 }
 0x5ae   : > { %v5232_v12 = vadd.f32 %v5231_v37, %v5230_v22 }
 0x5b0   : > { %4598 = vst [vmem:[%s7443_s18 + $0x18] sm:$0xff] %v5232_v12  ;;  %v5233_v36 = vpop.f32.mrb[136].mxu0 }
 0x5b1   : > { %v5234_v62 = vpop.f32.mrb[137].mxu0 }
 0x5b2   : > { %v5235_v51 = vadd.f32 %v5234_v62, %v5233_v36 }
 0x5b4   : > { %4599 = vst [vmem:[%s7443_s18 + $0x20] sm:$0xff] %v5235_v51  ;;  %v5236_v26 = vpop.f32.mrb[138].mxu0 }
 0x5b5   : > { %v5237_v63 = vpop.f32.mrb[139].mxu0 }
 0x5b6   : > { %v5238_v4 = vadd.f32 %v5237_v63, %v5236_v26 }
 0x5b8   : > { %4600 = vst [vmem:[%s7443_s18 + $0x28] sm:$0xff] %v5238_v4  ;;  %v5239_v8 = vpop.f32.mrb[140].mxu0 }
 0x5b9   : > { %v5240_v13 = vpop.f32.mrb[141].mxu0 }
 0x5ba   : > { %v5241_v17 = vadd.f32 %v5240_v13, %v5239_v8 }
 0x5bc   : > { %4601 = vst [vmem:[%s7443_s18 + $0x30] sm:$0xff] %v5241_v17  ;;  %v5242_v40 = vpop.f32.mrb[142].mxu0 }
 0x5bd   : > { %v5243_v30 = vpop.f32.mrb[143].mxu0 }
 0x5be   : > { %v5244_v23 = vadd.f32 %v5243_v30, %v5242_v40 }
 0x5c0   : > { %4602 = vst [vmem:[%s7443_s18 + $0x38] sm:$0xff] %v5244_v23 }
 0x5c1   : > { %6092 = shalt.err (!%p6089_p3)
}
 0x5c2   : > { %s6093_s22 = scalar_lea.hbm %s7457_s0, 1024  ;;  %s6097_s27 = scalar_lea.hbm %s7519_s14, 2048 }
 0x5c3   : > { %p6094_p4 = scmp.ne.s32.totalorder %s7457_s0, %s6093_s22  ;;  %p6098_p9 = scmp.lt.u32.totalorder %s7457_s0, %s7519_s14 }
 0x5c4   : > { %p6099_p10 = scmp.lt.u32.totalorder %s6097_s27, %s6093_s22  ;;  %p6101_p12 = scmp.lt.u32.totalorder %s6093_s22, %s7457_s0 }
 0x5c5   : > { %p6095_p7 = pnand %p6094_p4, %p6260_p5 }
 0x5c6   : > { %p6100_p11 = por %p6099_p10, %p6098_p9 }
 0x5c7   : > { %p6096_p8 = pneg %p6095_p7 }
 0x5c8   : > { %p6102_p13 = por %p6101_p12, %p6100_p11 }
 0x5ca   : > { %p6103_p0 = pnand %p6102_p13, %p6096_p8 }
 0x5cc   : > { %6106 = shalt.err (!%p6103_p0)
}
 0x5cd   : > { %s6145_s17 = smov 128   ;;  %s6146_s20 = smov 8  }
 0x5ce   : > { %5977 = dma.vmem_to_hbm [thread:$0]  (%p6260_p5), %s7459_s21, 1024, %s7457_s0, %s7464_s28, %s6145_s17, %s6145_s17, %s6146_s20  }
 0x5cf PF: > { %p5983_p1 = scmp.ge.s32.totalorder %s6141_s16, 2  ;;  %s4632_s18 = sand.u32 1, %s6129_s29  }
 0x5d0   : > { %s4633_s22 = scalar_lea.sflag [#allocation4], %s4632_s18 }
 0x5d1   : > { %p5980_p2 = pnand %p5983_p1, %p6264_p6 }
 0x5d3   : > { %6124 = dma.done.wait (!%p5980_p2), %s4633_s22, 1024  }
 0x5d4   : > { %6126 = vsyncadd (!%p5980_p2), %s4633_s22, 4294966272  ;;  %s7527_s25 = sld [smem:[#allocation6_spill]]  ;;  %s7528_s15 = sld [smem:[#allocation7_spill]] }
 0x5d5   : > { %p24_p3 = scmp.ge.s32.totalorder %s6247_s19, 4   ;;  %s7529_s29 = smov %s6133_s30 }
 0x5d6   : > { %s7531_s16 = smov %s6247_s19 }
 0x5d7   :  { %26 = sbr.rel (!%p24_p3) target bundleno = 5 (0x5), region = 121 }
 0x5da   : > { %s7530_s30 = smov %s7527_s25 }
 0x5de   :  { %4638 = vsyncpa [#allocation4], 1 }
 0x5df   :  { %4640 = vsyncpa [#allocation4 + $0x1], 1 }

</bundles_post_ra>
